<compile_context>
chip_gen: v6e
topology: v6e:2x2x1
jax: 0.10.0
libtpu: 0.0.40
codegen_flags: <defaults>
</compile_context>

<pallas_src>
import jax
import jax.numpy as jnp
from jax.experimental import pallas as pl
from jax.experimental.pallas import tpu as pltpu


_VMEM = pl.BlockSpec(memory_space=pltpu.MemorySpace.VMEM)


# ---------------------------------------------------------------------------
# Fused kernels
# ---------------------------------------------------------------------------
def _make_nonlinear_head_kernel(k: int, d: int):
    """k > 1 path.

    vm = x @ W + b   (bf16 MXU, f32 accumulate), kernel-ordered columns:
        [0, k*d)            inner matrix (row-major over (j, d'))
        [k*d, k*d+k)        inner bias
        [k*d+k, k*d+2k)     outer matrix
        [k*d+2k]            outer bias
    out = sigmoid( sum_j outer[:, j] * tanh(inner_j @ sem + ibias[:, j]) + obias )
    """
    def kernel(x_ref, w_ref, b_ref, sem_ref, o_ref):
        x = x_ref[...].astype(jnp.bfloat16)                       # (B, F) bf16
        vm = jnp.dot(x, w_ref[...], preferred_element_type=jnp.float32) + b_ref[...]
        sem = sem_ref[0].astype(jnp.float32)                      # (d, N)

        inner_bias = vm[:, k * d:k * d + k]                       # (B, k)
        outer_mat = vm[:, k * d + k:k * d + 2 * k]                # (B, k)
        outer_bias = vm[:, k * d + 2 * k:k * d + 2 * k + 1]       # (B, 1)

        acc = jnp.zeros((x_ref.shape[0], sem_ref.shape[-1]), jnp.float32)
        for j in range(k):                                        # static unroll (k small)
            mat_j = vm[:, j * d:(j + 1) * d]                      # (B, d)
            t_j = jnp.tanh(
                jnp.dot(mat_j, sem, preferred_element_type=jnp.float32)
                + inner_bias[:, j:j + 1])                         # (B, N)
            acc = acc + outer_mat[:, j:j + 1] * t_j               # VPU weighted k-reduction
        o_ref[...] = jax.nn.sigmoid(acc + outer_bias)
    return kernel


def _make_linear_head_kernel(d: int):
    """k == 1 path: out = sigmoid( (x@W+b)[:, :d] @ sem + (x@W+b)[:, d:] )."""
    def kernel(x_ref, w_ref, b_ref, sem_ref, o_ref):
        x = x_ref[...].astype(jnp.bfloat16)
        vm = jnp.dot(x, w_ref[...], preferred_element_type=jnp.float32) + b_ref[...]
        sem = sem_ref[0].astype(jnp.float32)
        mat = vm[:, :d]                                           # (B, d)
        bias = vm[:, d:d + 1]                                     # (B, 1)
        o_ref[...] = jax.nn.sigmoid(
            jnp.dot(mat, sem, preferred_element_type=jnp.float32) + bias)
    return kernel


# ---------------------------------------------------------------------------
# Module wrapper
# ---------------------------------------------------------------------------
class VGGPallas:
    FEATURE_DIM = 4096  # self.classifier = nn.Linear(4096, output_num)

    def __init__(self, k, d, key):
        self.k = k
        self.d = d
        self.non_linear_param = 0 if k == 1 else k + 1
        self.output_num = self.non_linear_param + k * (d + 1)

        kw, kb = jax.random.split(key)
        bound = 1.0 / (self.FEATURE_DIM ** 0.5)  # torch default Linear init range
        W = jax.random.uniform(
            kw, (self.FEATURE_DIM, self.output_num), jnp.float32, -bound, bound)
        b = jax.random.uniform(kb, (self.output_num,), jnp.float32, -bound, bound)
        self.set_classifier_params(W, b)
        # TODO(synk): the frozen vgg19_bn `features`/`transform` trunk is bypassed in
        # forward() (visual_matrix = visual), so it is intentionally not implemented.

    def set_classifier_params(self, W, b):
        """W: (F, output_num), b: (output_num,) in the torch column layout."""
        k, d, nlp = self.k, self.d, self.non_linear_param
        self.W_f32 = jnp.asarray(W, jnp.float32)   # torch layout, for reference/loading
        self.b_f32 = jnp.asarray(b, jnp.float32)
        if nlp == 0:
            Wk, bk = self.W_f32, self.b_f32        # already [matrix(d) | bias(1)]
        else:
            # torch layout: [outer(k) | obias(1) | inner(k*d) | ibias(k)]
            # kernel layout: [inner(k*d) | ibias(k) | outer(k) | obias(1)]
            Wk = jnp.concatenate(
                [self.W_f32[:, k + 1:k + 1 + k * d],
                 self.W_f32[:, k + 1 + k * d:],
                 self.W_f32[:, :k],
                 self.W_f32[:, k:k + 1]], axis=1)
            bk = jnp.concatenate(
                [self.b_f32[k + 1:k + 1 + k * d],
                 self.b_f32[k + 1 + k * d:],
                 self.b_f32[:k],
                 self.b_f32[k:k + 1]])
        self.W = Wk.astype(jnp.bfloat16)                       # (F, O) bf16, kernel order
        self.b = bk.astype(jnp.float32).reshape(1, self.output_num)

    def __call__(self, visual, semantics):
        B = visual.shape[0]
        k, d = self.k, self.d
        sem3 = jnp.asarray(semantics).reshape(1, d, -1)        # accepts (d,N) or (1,d,N)
        N = sem3.shape[-1]

        if self.non_linear_param == 0:
            kernel = _make_linear_head_kernel(d)
        else:
            kernel = _make_nonlinear_head_kernel(k, d)

        out = pl.pallas_call(
            kernel,
            out_shape=jax.ShapeDtypeStruct((B, N), jnp.float32),
            in_specs=[_VMEM, _VMEM, _VMEM, _VMEM],
            out_specs=_VMEM,
        )(visual, self.W, self.b, sem3)

        # torch: (B, 1, N).transpose(1, 2) -> (B, N, 1); sigmoid already applied in-kernel.
        return out.reshape(B, N, 1)


# ---------------------------------------------------------------------------
# Pure-JAX reference (torch-layout weights, f32) for correctness checking
# ---------------------------------------------------------------------------
def _reference_forward(W, b, visual, semantics, k, d):
    vm = visual.astype(jnp.float32) @ W + b                    # (B, O)
    B = vm.shape[0]
    sem = jnp.broadcast_to(semantics.reshape(1, d, -1),
                           (B, d, semantics.shape[-1])).astype(jnp.float32)
    nlp = 0 if k == 1 else k + 1
    if nlp == 0:
        mat = vm[:, :-1].reshape(B, k, d)
        bias = vm[:, -1].reshape(B, k)[..., None]
        st = jnp.matmul(mat, sem) + bias
    else:
        vo, vi = vm[:, :nlp], vm[:, nlp:]
        om = vo[:, :-1].reshape(B, 1, k)
        ob = vo[:, -1].reshape(B, 1)[..., None]
        im = vi[:, :-k].reshape(B, k, d)
        ib = vi[:, -k:].reshape(B, k)[..., None]
        st = jnp.tanh(jnp.matmul(im, sem) + ib)
        st = jnp.matmul(om, st) + ob
    return jax.nn.sigmoid(jnp.transpose(st, (0, 2, 1)))        # (B, N, 1)


if __name__ == "__main__":
    key = jax.random.PRNGKey(0)
    k_param_a, k_param_b, k_vis, k_sem = jax.random.split(key, 4)

    B = 2          # batch
    d = 32         # kwarg['d']  -> semantic embedding dim
    N = 16         # number of semantic classes/attributes

    visual = jax.random.normal(k_vis, (B, VGGPallas.FEATURE_DIM), jnp.float32)
    semantics = jax.random.normal(k_sem, (1, d, N), jnp.float32)

    # Exercise both code paths: k > 1 (nonlinear head) and k == 1 (linear head).
    for k_comp, sub in ((4, k_param_a), (1, k_param_b)):
        model = VGGPallas(k=k_comp, d=d, key=sub)
        out = model(visual, semantics)
        jax.block_until_ready(out)

        assert out.shape == (B, N, 1), out.shape
        assert bool(jnp.all((out >= 0.0) & (out <= 1.0)))

        ref = _reference_forward(model.W_f32, model.b_f32, visual, semantics, k_comp, d)
        err = float(jnp.max(jnp.abs(out - ref)))
        assert err < 2e-2, f"k={k_comp}: max abs err {err} vs f32 reference"

    print("KERNEL_OK")
</pallas_src>

<mosaic_0001>
module attributes {stable_mosaic.version = 11 : i64} {
  func.func @kernel(%arg0: memref<2x4096xf32, #tpu.memory_space<vmem>>, %arg1: memref<4096x137xbf16, #tpu.memory_space<vmem>>, %arg2: memref<1x137xf32, #tpu.memory_space<vmem>>, %arg3: memref<1x32x16xf32, #tpu.memory_space<vmem>>, %arg4: memref<2x16xf32, #tpu.memory_space<vmem>>) attributes {dimension_semantics = [], scalar_prefetch = 0 : i64, scratch_operands = 0 : i64, tpu.core_type = #tpu.core_type<tc>} {
    %c0 = arith.constant 0 : index
    %c0_0 = arith.constant 0 : index
    %0 = vector.load %arg0[%c0, %c0_0] : memref<2x4096xf32, #tpu.memory_space<vmem>>, vector<2x4096xf32>
    %1 = arith.truncf %0 : vector<2x4096xf32> to vector<2x4096xbf16>
    %c0_1 = arith.constant 0 : index
    %c0_2 = arith.constant 0 : index
    %2 = vector.load %arg1[%c0_1, %c0_2] : memref<4096x137xbf16, #tpu.memory_space<vmem>>, vector<4096x137xbf16>
    %cst = arith.constant dense<0.000000e+00> : vector<2x137xf32>
    %3 = tpu.matmul %1, %2, %cst {dimension_numbers = #tpu.dot_dimension_numbers<[1], [0], [0], [1], [0, 0, 1, 1], [], []>} : vector<2x4096xbf16>, vector<4096x137xbf16>, vector<2x137xf32> -> vector<2x137xf32>
    %c0_3 = arith.constant 0 : index
    %c0_4 = arith.constant 0 : index
    %4 = vector.load %arg2[%c0_3, %c0_4] : memref<1x137xf32, #tpu.memory_space<vmem>>, vector<1x137xf32>
    %5 = vector.broadcast %4 : vector<1x137xf32> to vector<2x137xf32>
    %6 = arith.addf %3, %5 : vector<2x137xf32>
    %c0_5 = arith.constant 0 : index
    %c0_6 = arith.constant 0 : index
    %c0_7 = arith.constant 0 : index
    %7 = vector.load %arg3[%c0_5, %c0_6, %c0_7] : memref<1x32x16xf32, #tpu.memory_space<vmem>>, vector<1x32x16xf32>
    %8 = vector.shape_cast %7 : vector<1x32x16xf32> to vector<32x16xf32>
    %9 = vector.extract_strided_slice %6 {offsets = [0, 128], sizes = [2, 4], strides = [1, 1]} : vector<2x137xf32> to vector<2x4xf32>
    %10 = vector.extract_strided_slice %6 {offsets = [0, 132], sizes = [2, 4], strides = [1, 1]} : vector<2x137xf32> to vector<2x4xf32>
    %11 = vector.extract_strided_slice %6 {offsets = [0, 136], sizes = [2, 1], strides = [1, 1]} : vector<2x137xf32> to vector<2x1xf32>
    %cst_8 = arith.constant 0.000000e+00 : f32
    %12 = vector.broadcast %cst_8 : f32 to vector<2x16xf32>
    %13 = vector.extract_strided_slice %6 {offsets = [0, 0], sizes = [2, 32], strides = [1, 1]} : vector<2x137xf32> to vector<2x32xf32>
    %cst_9 = arith.constant dense<0.000000e+00> : vector<2x16xf32>
    %14 = tpu.matmul %13, %8, %cst_9 {dimension_numbers = #tpu.dot_dimension_numbers<[1], [0], [0], [1], [0, 0, 1, 1], [], []>} : vector<2x32xf32>, vector<32x16xf32>, vector<2x16xf32> -> vector<2x16xf32>
    %15 = vector.extract_strided_slice %9 {offsets = [0, 0], sizes = [2, 1], strides = [1, 1]} : vector<2x4xf32> to vector<2x1xf32>
    %16 = vector.broadcast %15 : vector<2x1xf32> to vector<2x16xf32>
    %17 = arith.addf %14, %16 : vector<2x16xf32>
    %18 = math.tanh %17 : vector<2x16xf32>
    %19 = vector.extract_strided_slice %10 {offsets = [0, 0], sizes = [2, 1], strides = [1, 1]} : vector<2x4xf32> to vector<2x1xf32>
    %20 = vector.broadcast %19 : vector<2x1xf32> to vector<2x16xf32>
    %21 = arith.mulf %20, %18 : vector<2x16xf32>
    %22 = arith.addf %12, %21 : vector<2x16xf32>
    %23 = vector.extract_strided_slice %6 {offsets = [0, 32], sizes = [2, 32], strides = [1, 1]} : vector<2x137xf32> to vector<2x32xf32>
    %cst_10 = arith.constant dense<0.000000e+00> : vector<2x16xf32>
    %24 = tpu.matmul %23, %8, %cst_10 {dimension_numbers = #tpu.dot_dimension_numbers<[1], [0], [0], [1], [0, 0, 1, 1], [], []>} : vector<2x32xf32>, vector<32x16xf32>, vector<2x16xf32> -> vector<2x16xf32>
    %25 = vector.extract_strided_slice %9 {offsets = [0, 1], sizes = [2, 1], strides = [1, 1]} : vector<2x4xf32> to vector<2x1xf32>
    %26 = vector.broadcast %25 : vector<2x1xf32> to vector<2x16xf32>
    %27 = arith.addf %24, %26 : vector<2x16xf32>
    %28 = math.tanh %27 : vector<2x16xf32>
    %29 = vector.extract_strided_slice %10 {offsets = [0, 1], sizes = [2, 1], strides = [1, 1]} : vector<2x4xf32> to vector<2x1xf32>
    %30 = vector.broadcast %29 : vector<2x1xf32> to vector<2x16xf32>
    %31 = arith.mulf %30, %28 : vector<2x16xf32>
    %32 = arith.addf %22, %31 : vector<2x16xf32>
    %33 = vector.extract_strided_slice %6 {offsets = [0, 64], sizes = [2, 32], strides = [1, 1]} : vector<2x137xf32> to vector<2x32xf32>
    %cst_11 = arith.constant dense<0.000000e+00> : vector<2x16xf32>
    %34 = tpu.matmul %33, %8, %cst_11 {dimension_numbers = #tpu.dot_dimension_numbers<[1], [0], [0], [1], [0, 0, 1, 1], [], []>} : vector<2x32xf32>, vector<32x16xf32>, vector<2x16xf32> -> vector<2x16xf32>
    %35 = vector.extract_strided_slice %9 {offsets = [0, 2], sizes = [2, 1], strides = [1, 1]} : vector<2x4xf32> to vector<2x1xf32>
    %36 = vector.broadcast %35 : vector<2x1xf32> to vector<2x16xf32>
    %37 = arith.addf %34, %36 : vector<2x16xf32>
    %38 = math.tanh %37 : vector<2x16xf32>
    %39 = vector.extract_strided_slice %10 {offsets = [0, 2], sizes = [2, 1], strides = [1, 1]} : vector<2x4xf32> to vector<2x1xf32>
    %40 = vector.broadcast %39 : vector<2x1xf32> to vector<2x16xf32>
    %41 = arith.mulf %40, %38 : vector<2x16xf32>
    %42 = arith.addf %32, %41 : vector<2x16xf32>
    %43 = vector.extract_strided_slice %6 {offsets = [0, 96], sizes = [2, 32], strides = [1, 1]} : vector<2x137xf32> to vector<2x32xf32>
    %cst_12 = arith.constant dense<0.000000e+00> : vector<2x16xf32>
    %44 = tpu.matmul %43, %8, %cst_12 {dimension_numbers = #tpu.dot_dimension_numbers<[1], [0], [0], [1], [0, 0, 1, 1], [], []>} : vector<2x32xf32>, vector<32x16xf32>, vector<2x16xf32> -> vector<2x16xf32>
    %45 = vector.extract_strided_slice %9 {offsets = [0, 3], sizes = [2, 1], strides = [1, 1]} : vector<2x4xf32> to vector<2x1xf32>
    %46 = vector.broadcast %45 : vector<2x1xf32> to vector<2x16xf32>
    %47 = arith.addf %44, %46 : vector<2x16xf32>
    %48 = math.tanh %47 : vector<2x16xf32>
    %49 = vector.extract_strided_slice %10 {offsets = [0, 3], sizes = [2, 1], strides = [1, 1]} : vector<2x4xf32> to vector<2x1xf32>
    %50 = vector.broadcast %49 : vector<2x1xf32> to vector<2x16xf32>
    %51 = arith.mulf %50, %48 : vector<2x16xf32>
    %52 = arith.addf %42, %51 : vector<2x16xf32>
    %53 = vector.broadcast %11 : vector<2x1xf32> to vector<2x16xf32>
    %54 = arith.addf %52, %53 : vector<2x16xf32>
    %55 = arith.negf %54 : vector<2x16xf32>
    %56 = math.exp %55 : vector<2x16xf32>
    %cst_13 = arith.constant 1.000000e+00 : f32
    %57 = vector.broadcast %cst_13 : f32 to vector<2x16xf32>
    %58 = arith.addf %57, %56 : vector<2x16xf32>
    %59 = arith.divf %57, %58 : vector<2x16xf32>
    %c0_14 = arith.constant 0 : index
    %c0_15 = arith.constant 0 : index
    %60 = vector.load %arg4[%c0_14, %c0_15] : memref<2x16xf32, #tpu.memory_space<vmem>>, vector<2x16xf32>
    tpu.vector_store %arg4[%c0_14, %c0_15], %59 {strides = array<i32>} : memref<2x16xf32, #tpu.memory_space<vmem>>, vector<2x16xf32>,
    return
  }
}

</mosaic_0001>

<bundles_post_ra>
// kernel: tpu_custom_call.1
= control target key start
LH: loop header
LB: loop body
LE: loop exit
PB: predicated region body
PF: predicated region fallthrough
CT: control target
= control target key end

     0   :  { %v5763_v36 = vmov 1983009808   ;;  %v38_v38 = vlaneseq  ;;  %s7565_s0 = inlined_call_operand.vmem [shape: f32[2,4096], index: 0, kind: input, shape index: {}]   ;;  %s7566_s1 = inlined_call_operand.vmem [shape: bf16[4096,137], index: 1, kind: input, shape index: {}]   ;;  %s7567_s2 = inlined_call_operand.vmem [shape: f32[1,137], index: 2, kind: input, shape index: {}]   ;;  %s7568_s3 = inlined_call_operand.vmem [shape: f32[1,32,16], index: 3, kind: input, shape index: {}]   ;;  %s7569_s4 = inlined_call_operand.hbm [shape: f32[2,16], index: 4, kind: output, shape index: {}]  }
   0x1   :  { %v4953_v0 = vld [vmem:[%s7566_s1 + $0x74] ss:$8 sps:$4 sm:$0xff]   ;;  %v4957_v2 = vld [vmem:[%s7566_s1 + $0x70] ss:$8 sps:$4 sm:$0xff]   ;;  %v4959_v4 = vld [vmem:[%s7566_s1 + $0x64] ss:$8 sps:$4 sm:$0xff]   ;;  %v36_v37 = vunpack.c.l.s4 %v5763_v36 }
   0x2   :  { %v4955_v1 = vld [vmem:[%s7566_s1 + $0x174] ss:$8 sps:$4 sm:$0xff]   ;;  %3318 = vmatprep.subr.bf16.mxu0 %v4953_v0  ;;  %v4958_v3 = vld [vmem:[%s7566_s1 + $0x170] ss:$8 sps:$4 sm:$0xff]   ;;  %v4961_v5 = vld [vmem:[%s7566_s1 + $0x164] ss:$8 sps:$4 sm:$0xff]  }
   0x3   :  { %3359 = vmatprep.subr.bf16.mxu1 %v4955_v1  ;;  %3319 = vmatpush1.bf16.msra.mxu0 %v4957_v2  ;;  %v4963_v6 = vld [vmem:[%s7566_s1 + $0x60] ss:$8 sps:$4 sm:$0xff]   ;;  %v4965_v8 = vld [vmem:[%s7566_s1 + $0x54] ss:$8 sps:$4 sm:$0xff]   ;;  %v4969_v10 = vld [vmem:[%s7566_s1 + $0x50] ss:$8 sps:$4 sm:$0xff]   ;;  %v37_v42 = vunpack.c.0.s8 %v36_v37 }
   0x4   :  { %3360 = vmatpush1.bf16.msra.mxu1 %v4958_v3  ;;  %3320 = vmatprep.subr.bf16.mxu0 %v4959_v4  ;;  %v4964_v7 = vld [vmem:[%s7566_s1 + $0x160] ss:$8 sps:$4 sm:$0xff]   ;;  %v4967_v9 = vld [vmem:[%s7566_s1 + $0x154] ss:$8 sps:$4 sm:$0xff]   ;;  %v4970_v11 = vld [vmem:[%s7566_s1 + $0x150] ss:$8 sps:$4 sm:$0xff]  }
   0x5   :  { %3361 = vmatprep.subr.bf16.mxu1 %v4961_v5  ;;  %v4971_v12 = vld [vmem:[%s7566_s1 + $0x44] ss:$8 sps:$4 sm:$0xff]   ;;  %v4975_v14 = vld [vmem:[%s7566_s1 + $0x40] ss:$8 sps:$4 sm:$0xff]   ;;  %v4977_v16 = vld [vmem:[%s7566_s1 + $0x34] ss:$8 sps:$4 sm:$0xff]  }
   0x6   :  { %v4973_v13 = vld [vmem:[%s7566_s1 + $0x144] ss:$8 sps:$4 sm:$0xff]   ;;  %v4976_v15 = vld [vmem:[%s7566_s1 + $0x140] ss:$8 sps:$4 sm:$0xff]   ;;  %v4979_v17 = vld [vmem:[%s7566_s1 + $0x134] ss:$8 sps:$4 sm:$0xff]  }
   0x7   :  { %3321 = vmatpush1.bf16.msra.mxu0 %v4963_v6  ;;  %v4981_v18 = vld [vmem:[%s7566_s1 + $0x30] ss:$8 sps:$4 sm:$0xff]   ;;  %v4983_v20 = vld [vmem:[%s7566_s1 + $0x24] ss:$8 sps:$4 sm:$0xff]   ;;  %v4987_v22 = vld [vmem:[%s7566_s1 + $0x20] ss:$8 sps:$4 sm:$0xff]  }
   0x8   :  { %3362 = vmatpush1.bf16.msra.mxu1 %v4964_v7  ;;  %3322 = vmatprep.subr.bf16.mxu0 %v4965_v8  ;;  %v4982_v19 = vld [vmem:[%s7566_s1 + $0x130] ss:$8 sps:$4 sm:$0xff]   ;;  %v4985_v21 = vld [vmem:[%s7566_s1 + $0x124] ss:$8 sps:$4 sm:$0xff]   ;;  %v4988_v23 = vld [vmem:[%s7566_s1 + $0x120] ss:$8 sps:$4 sm:$0xff]  }
   0x9   :  { %3363 = vmatprep.subr.bf16.mxu1 %v4967_v9  ;;  %v4989_v24 = vld [vmem:[%s7566_s1 + $0x14] ss:$8 sps:$4 sm:$0xff]   ;;  %v4993_v26 = vld [vmem:[%s7566_s1 + $0x10] ss:$8 sps:$4 sm:$0xff]   ;;  %v4995_v28 = vld [vmem:[%s7566_s1 + $0x4] ss:$8 sps:$4 sm:$0xff]  }
   0xa   :  { %v4991_v25 = vld [vmem:[%s7566_s1 + $0x114] ss:$8 sps:$4 sm:$0xff]   ;;  %v4994_v27 = vld [vmem:[%s7566_s1 + $0x110] ss:$8 sps:$4 sm:$0xff]   ;;  %v4997_v29 = vld [vmem:[%s7566_s1 + $0x104] ss:$8 sps:$4 sm:$0xff]  }
   0xb   :  { %3323 = vmatpush1.bf16.msra.mxu0 %v4969_v10  ;;  %v4999_v30 = vld [vmem:[%s7566_s1] ss:$8 sps:$4 sm:$0xff]   ;;  %v5001_v32 = vld [vmem:[%s7566_s1 + $0xf4] ss:$8 sps:$4 sm:$0xff]   ;;  %v5005_v34 = vld [vmem:[%s7566_s1 + $0xf0] ss:$8 sps:$4 sm:$0xff]  }
   0xc   :  { %3364 = vmatpush1.bf16.msra.mxu1 %v4970_v11  ;;  %3324 = vmatprep.subr.bf16.mxu0 %v4971_v12  ;;  %v5000_v31 = vld [vmem:[%s7566_s1 + $0x100] ss:$8 sps:$4 sm:$0xff]   ;;  %v5003_v33 = vld [vmem:[%s7566_s1 + $0x1f4] ss:$8 sps:$4 sm:$0xff]   ;;  %v5006_v35 = vld [vmem:[%s7566_s1 + $0x1f0] ss:$8 sps:$4 sm:$0xff]  }
   0xd   :  { %3365 = vmatprep.subr.bf16.mxu1 %v4973_v13  ;;  %v5007_v39 = vld [vmem:[%s7566_s1 + $0xe4] ss:$8 sps:$4 sm:$0xff]   ;;  %v5011_v41 = vld [vmem:[%s7566_s1 + $0xe0] ss:$8 sps:$4 sm:$0xff]   ;;  %v5921_v43 = vshrl.u32 %v38_v38, 7 }
   0xe   :  { %v5009_v40 = vld [vmem:[%s7566_s1 + $0x1e4] ss:$8 sps:$4 sm:$0xff]   ;;  %v5012_v44 = vld [vmem:[%s7566_s1 + $0x1e0] ss:$8 sps:$4 sm:$0xff]   ;;  %v5013_v45 = vld [vmem:[%s7566_s1 + $0xd4] ss:$8 sps:$4 sm:$0xff]  }
   0xf   :  { %3325 = vmatpush1.bf16.msra.mxu0 %v4975_v14  ;;  %v5015_v46 = vld [vmem:[%s7566_s1 + $0x1d4] ss:$8 sps:$4 sm:$0xff]   ;;  %v5017_v47 = vld [vmem:[%s7566_s1 + $0xd0] ss:$8 sps:$4 sm:$0xff]   ;;  %v5939_v49 = vsub.s32 %v37_v42, %v5921_v43  ;;  %v5019_v50 = vld [vmem:[%s7566_s1 + $0xc4] ss:$8 sps:$4 sm:$0xff]  }
  0x10   :  { %3366 = vmatpush1.bf16.msra.mxu1 %v4976_v15  ;;  %3326 = vmatprep.subr.bf16.mxu0 %v4977_v16  ;;  %v5018_v48 = vld [vmem:[%s7566_s1 + $0x1d0] ss:$8 sps:$4 sm:$0xff]   ;;  %v5021_v51 = vld [vmem:[%s7566_s1 + $0x1c4] ss:$8 sps:$4 sm:$0xff]   ;;  %v5023_v53 = vld [vmem:[%s7566_s1 + $0xc0] ss:$8 sps:$4 sm:$0xff]  }
  0x11   :  { %3367 = vmatprep.subr.bf16.mxu1 %v4979_v17  ;;  %v18_v52 = vld [vmem:[%s7565_s0] sm:$0xff]  ;;  %v5025_v57 = vld [vmem:[%s7566_s1 + $0xb4] ss:$8 sps:$4 sm:$0xff]   ;;  %v5029_v61 = vld [vmem:[%s7566_s1 + $0xb0] ss:$8 sps:$4 sm:$0xff]  }
  0x12   :  { %v41_v54 = vrot.slane %v18_v52, %v5939_v49  ;;  %v34_v55 = vcombine.high %v18_v52, %v18_v52  ;;  %v5024_v56 = vld [vmem:[%s7566_s1 + $0x1c0] ss:$8 sps:$4 sm:$0xff]   ;;  %v5027_v58 = vld [vmem:[%s7566_s1 + $0x1b4] ss:$8 sps:$4 sm:$0xff]   ;;  %v5030_v0 = vld [vmem:[%s7566_s1 + $0x1b0] ss:$8 sps:$4 sm:$0xff]  }
  0x13   :  { %3327 = vmatpush1.bf16.msra.mxu0 %v4981_v18  ;;  %v5031_v1 = vld [vmem:[%s7566_s1 + $0xa4] ss:$8 sps:$4 sm:$0xff]   ;;  %v5035_v4 = vld [vmem:[%s7566_s1 + $0xa0] ss:$8 sps:$4 sm:$0xff]   ;;  %v5037_v6 = vld [vmem:[%s7566_s1 + $0x94] ss:$8 sps:$4 sm:$0xff]  }
  0x14   :  { %3368 = vmatpush1.bf16.msra.mxu1 %v4982_v19  ;;  %3328 = vmatprep.subr.bf16.mxu0 %v4983_v20  ;;  %v49_v59 = vcombine.high %v41_v54, %v41_v54  ;;  %v48_v60 = vrot.slane %v34_v55, %v5939_v49  ;;  %v5033_v2 = vld [vmem:[%s7566_s1 + $0x1a4] ss:$8 sps:$4 sm:$0xff]   ;;  %v5036_v5 = vld [vmem:[%s7566_s1 + $0x1a0] ss:$8 sps:$4 sm:$0xff]   ;;  %v5039_v7 = vld [vmem:[%s7566_s1 + $0x194] ss:$8 sps:$4 sm:$0xff]   ;;  %v202_v16 = vpack.c.bf16 %v41_v54, %v41_v54 }
  0x15   :  { %3369 = vmatprep.subr.bf16.mxu1 %v4985_v21  ;;  %v5041_v8 = vld [vmem:[%s7566_s1 + $0x90] ss:$8 sps:$4 sm:$0xff]   ;;  %v5043_v10 = vld [vmem:[%s7566_s1 + $0x84] ss:$8 sps:$4 sm:$0xff]   ;;  %v5047_v12 = vld [vmem:[%s7566_s1 + $0x80] ss:$8 sps:$4 sm:$0xff]  }
  0x16   :  { %v203_v62 = vpack.c.bf16 %v49_v59, %v49_v59  ;;  %v50_v63 = vcombine.high %v48_v60, %v48_v60  ;;  %v5042_v9 = vld [vmem:[%s7566_s1 + $0x190] ss:$8 sps:$4 sm:$0xff]   ;;  %v5045_v11 = vld [vmem:[%s7566_s1 + $0x184] ss:$8 sps:$4 sm:$0xff]   ;;  %v5048_v13 = vld [vmem:[%s7566_s1 + $0x180] ss:$8 sps:$4 sm:$0xff]   ;;  %v204_v17 = vpack.c.bf16 %v48_v60, %v48_v60 }
  0x17   :  { %3329 = vmatpush1.bf16.msra.mxu0 %v4987_v22  ;;  %v5052_v14 = vld [vmem:[%s7566_s1 + $0x274] ss:$8 sps:$4 sm:$0xff]   ;;  %v5050_v18 = vld [vmem:[%s7566_s1 + $0x270] ss:$8 sps:$4 sm:$0xff]   ;;  %v5058_v20 = vld [vmem:[%s7566_s1 + $0x264] ss:$8 sps:$4 sm:$0xff]  }
  0x18   :  { %3370 = vmatpush1.bf16.msra.mxu1 %v4988_v23  ;;  %3330 = vmatprep.subr.bf16.mxu0 %v4989_v24  ;;  %v205_v3 = vpack.c.bf16 %v50_v63, %v50_v63  ;;  %v5055_v15 = vld [vmem:[%s7566_s1 + $0x374] ss:$8 sps:$4 sm:$0xff]   ;;  %v5053_v19 = vld [vmem:[%s7566_s1 + $0x370] ss:$8 sps:$4 sm:$0xff]   ;;  %v5061_v21 = vld [vmem:[%s7566_s1 + $0x364] ss:$8 sps:$4 sm:$0xff]  }
  0x19   :  { %3371 = vmatprep.subr.bf16.mxu1 %v4991_v25  ;;  %3350 = vmatprep.mubr.bf16.mxu0 %v203_v62  ;;  %v5056_v22 = vld [vmem:[%s7566_s1 + $0x260] ss:$8 sps:$4 sm:$0xff]   ;;  %v5064_v24 = vld [vmem:[%s7566_s1 + $0x254] ss:$8 sps:$4 sm:$0xff]   ;;  %v5082_v36 = vld [vmem:[%s7566_s1 + $0x224] ss:$8 sps:$4 sm:$0xff]  }
  0x1a   :  { %3391 = vmatprep.mubr.bf16.mxu1 %v205_v3  ;;  %v5059_v23 = vld [vmem:[%s7566_s1 + $0x360] ss:$8 sps:$4 sm:$0xff]   ;;  %v5067_v25 = vld [vmem:[%s7566_s1 + $0x354] ss:$8 sps:$4 sm:$0xff]   ;;  %v5085_v37 = vld [vmem:[%s7566_s1 + $0x324] ss:$8 sps:$4 sm:$0xff]  }
  0x1b   :  { %3331 = vmatpush1.bf16.msra.mxu0 %v4993_v26  ;;  %v5062_v26 = vld [vmem:[%s7566_s1 + $0x250] ss:$8 sps:$4 sm:$0xff]   ;;  %v5080_v38 = vld [vmem:[%s7566_s1 + $0x220] ss:$8 sps:$4 sm:$0xff]   ;;  %v5097_v52 = vld [vmem:[%s7566_s1 + $0x304] ss:$8 sps:$4 sm:$0xff]  }
  0x1c   :  { %3372 = vmatpush1.bf16.msra.mxu1 %v4994_v27  ;;  %3332 = vmatprep.subr.bf16.mxu0 %v4995_v28  ;;  %v5065_v27 = vld [vmem:[%s7566_s1 + $0x350] ss:$8 sps:$4 sm:$0xff]   ;;  %v5070_v28 = vld [vmem:[%s7566_s1 + $0x244] ss:$8 sps:$4 sm:$0xff]   ;;  %v5092_v55 = vld [vmem:[%s7566_s1 + $0x200] ss:$8 sps:$4 sm:$0xff]  }
  0x1d   :  { %3373 = vmatprep.subr.bf16.mxu1 %v4997_v29  ;;  %v5073_v29 = vld [vmem:[%s7566_s1 + $0x344] ss:$8 sps:$4 sm:$0xff]   ;;  %v5103_v59 = vld [vmem:[%s7566_s1 + $0x3f4] ss:$8 sps:$4 sm:$0xff]   ;;  %v5098_v60 = vld [vmem:[%s7566_s1 + $0x2f0] ss:$8 sps:$4 sm:$0xff]  }
  0x1e   :  { %v19_v42 = vld [vmem:[%s7565_s0 + $0x8] sm:$0xff]  ;;  %v5115_v3 = vld [vmem:[%s7566_s1 + $0x3d4] ss:$8 sps:$4 sm:$0xff]  }
  0x1f   :  { %3333 = vmatpush1.bf16.msra.mxu0 %v4999_v30  ;;  %v5068_v30 = vld [vmem:[%s7566_s1 + $0x240] ss:$8 sps:$4 sm:$0xff]   ;;  %v5106_v62 = vld [vmem:[%s7566_s1 + $0x2e4] ss:$8 sps:$4 sm:$0xff]  }
  0x20   :  { %3374 = vmatpush1.bf16.msra.mxu1 %v5000_v31  ;;  %3334 = vmatprep.subr.bf16.mxu0 %v5001_v32  ;;  %v5071_v31 = vld [vmem:[%s7566_s1 + $0x340] ss:$8 sps:$4 sm:$0xff]   ;;  %v5076_v32 = vld [vmem:[%s7566_s1 + $0x234] ss:$8 sps:$4 sm:$0xff]   ;;  %v5109_v63 = vld [vmem:[%s7566_s1 + $0x3e4] ss:$8 sps:$4 sm:$0xff]  }
  0x21   :  { %3375 = vmatprep.subr.bf16.mxu1 %v5003_v33  ;;  %v5079_v33 = vld [vmem:[%s7566_s1 + $0x334] ss:$8 sps:$4 sm:$0xff]  }
  0x23   :  { %3335 = vmatpush2.bf16.msra.mxu0 %v5005_v34  ;;  %v5074_v34 = vld [vmem:[%s7566_s1 + $0x230] ss:$8 sps:$4 sm:$0xff]  }
  0x24   :  { %3376 = vmatpush2.bf16.msra.mxu1 %v5006_v35  ;;  %3336 = vmatprep.subr.bf16.mxu0 %v5007_v39  ;;  %v5077_v35 = vld [vmem:[%s7566_s1 + $0x330] ss:$8 sps:$4 sm:$0xff]   ;;  %v5083_v39 = vld [vmem:[%s7566_s1 + $0x320] ss:$8 sps:$4 sm:$0xff]  }
  0x25   :  { %3377 = vmatprep.subr.bf16.mxu1 %v5009_v40  ;;  %v5088_v40 = vld [vmem:[%s7566_s1 + $0x214] ss:$8 sps:$4 sm:$0xff]  }
  0x27   :  { %3337 = vmatpush2.bf16.msra.mxu0 %v5011_v41  ;;  %v5091_v41 = vld [vmem:[%s7566_s1 + $0x314] ss:$8 sps:$4 sm:$0xff]  }
  0x28   :  { %3378 = vmatpush2.bf16.msra.mxu1 %v5012_v44  ;;  %3338 = vmatprep.subr.bf16.mxu0 %v5013_v45  ;;  %v6088_v44 = vrot.slane %v19_v42, %v5939_v49  ;;  %v51_v45 = vcombine.high %v19_v42, %v19_v42  ;;  %v5164_v42 = vld [vmem:[%s7566_s1 + $0x554] ss:$8 sps:$4 sm:$0xff]  }
  0x29   :  { %3379 = vmatprep.subr.bf16.mxu1 %v5015_v46  ;;  %v5086_v46 = vld [vmem:[%s7566_s1 + $0x210] ss:$8 sps:$4 sm:$0xff]  }
  0x2b   :  { %3339 = vmatpush2.bf16.msra.mxu0 %v5017_v47  ;;  %v5089_v47 = vld [vmem:[%s7566_s1 + $0x310] ss:$8 sps:$4 sm:$0xff]  }
  0x2c   :  { %3380 = vmatpush2.bf16.msra.mxu1 %v5018_v48  ;;  %3340 = vmatprep.subr.bf16.mxu0 %v5019_v50  ;;  %v66_v48 = vcombine.high %v6088_v44, %v6088_v44  ;;  %v6099_v50 = vrot.slane %v51_v45, %v5939_v49 }
  0x2d   :  { %3381 = vmatprep.subr.bf16.mxu1 %v5021_v51  ;;  %v5094_v51 = vld [vmem:[%s7566_s1 + $0x204] ss:$8 sps:$4 sm:$0xff]  }
  0x2e   :  { %v67_v54 = vcombine.high %v6099_v50, %v6099_v50 }
  0x2f   :  { %3341 = vmatpush2.bf16.msra.mxu0 %v5023_v53  ;;  %v207_v53 = vpack.c.bf16 %v66_v48, %v66_v48  ;;  %v5162_v48 = vld [vmem:[%s7566_s1 + $0x550] ss:$8 sps:$4 sm:$0xff]  }
  0x30   :  { %3382 = vmatpush2.bf16.msra.mxu1 %v5024_v56  ;;  %3342 = vmatprep.subr.bf16.mxu0 %v5025_v57  ;;  %v5095_v56 = vld [vmem:[%s7566_s1 + $0x300] ss:$8 sps:$4 sm:$0xff]   ;;  %v209_v57 = vpack.c.bf16 %v67_v54, %v67_v54  ;;  %v5173_v54 = vld [vmem:[%s7566_s1 + $0x434] ss:$8 sps:$4 sm:$0xff]  }
  0x31   :  { %3383 = vmatprep.subr.bf16.mxu1 %v5027_v58  ;;  %v5100_v58 = vld [vmem:[%s7566_s1 + $0x2f4] ss:$8 sps:$4 sm:$0xff]  }
  0x33   :  { %3343 = vmatpush2.bf16.msra.mxu0 %v5029_v61  ;;  %v5101_v61 = vld [vmem:[%s7566_s1 + $0x3f0] ss:$8 sps:$4 sm:$0xff]  }
  0x34   :  { %3384 = vmatpush2.bf16.msra.mxu1 %v5030_v0  ;;  %3344 = vmatprep.subr.bf16.mxu0 %v5031_v1  ;;  %v5104_v0 = vld [vmem:[%s7566_s1 + $0x2e0] ss:$8 sps:$4 sm:$0xff]  }
  0x35   :  { %3385 = vmatprep.subr.bf16.mxu1 %v5033_v2  ;;  %v5107_v1 = vld [vmem:[%s7566_s1 + $0x3e0] ss:$8 sps:$4 sm:$0xff]   ;;  %v5112_v2 = vld [vmem:[%s7566_s1 + $0x2d4] ss:$8 sps:$4 sm:$0xff]  }
  0x37   :  { %3345 = vmatpush2.bf16.msra.mxu0 %v5035_v4  ;;  %v5110_v4 = vld [vmem:[%s7566_s1 + $0x2d0] ss:$8 sps:$4 sm:$0xff]  }
  0x38   :  { %3386 = vmatpush2.bf16.msra.mxu1 %v5036_v5  ;;  %3346 = vmatprep.subr.bf16.mxu0 %v5037_v6  ;;  %v5113_v5 = vld [vmem:[%s7566_s1 + $0x3d0] ss:$8 sps:$4 sm:$0xff]   ;;  %v5118_v6 = vld [vmem:[%s7566_s1 + $0x2c4] ss:$8 sps:$4 sm:$0xff]  }
  0x39   :  { %3387 = vmatprep.subr.bf16.mxu1 %v5039_v7  ;;  %v5121_v7 = vld [vmem:[%s7566_s1 + $0x3c4] ss:$8 sps:$4 sm:$0xff]  }
  0x3b   :  { %3347 = vmatpush2.bf16.msra.mxu0 %v5041_v8  ;;  %v5116_v8 = vld [vmem:[%s7566_s1 + $0x2c0] ss:$8 sps:$4 sm:$0xff]  }
  0x3c   :  { %3388 = vmatpush2.bf16.msra.mxu1 %v5042_v9  ;;  %3348 = vmatprep.subr.bf16.mxu0 %v5043_v10  ;;  %v5119_v9 = vld [vmem:[%s7566_s1 + $0x3c0] ss:$8 sps:$4 sm:$0xff]   ;;  %v5124_v10 = vld [vmem:[%s7566_s1 + $0x2b4] ss:$8 sps:$4 sm:$0xff]  }
  0x3d   :  { %3389 = vmatprep.subr.bf16.mxu1 %v5045_v11  ;;  %v5127_v11 = vld [vmem:[%s7566_s1 + $0x3b4] ss:$8 sps:$4 sm:$0xff]  }
  0x3f   :  { %3349 = vmatpush2.bf16.msra.mxu0 %v5047_v12  ;;  %v5122_v12 = vld [vmem:[%s7566_s1 + $0x2b0] ss:$8 sps:$4 sm:$0xff]  }
  0x40   :  { %3390 = vmatpush2.bf16.msra.mxu1 %v5048_v13  ;;  %3400 = vmatprep.subr.bf16.mxu0 %v5052_v14  ;;  %v5125_v13 = vld [vmem:[%s7566_s1 + $0x3b0] ss:$8 sps:$4 sm:$0xff]   ;;  %v5130_v14 = vld [vmem:[%s7566_s1 + $0x2a4] ss:$8 sps:$4 sm:$0xff]  }
  0x41   :  { %3441 = vmatprep.subr.bf16.mxu1 %v5055_v15  ;;  %v5133_v15 = vld [vmem:[%s7566_s1 + $0x3a4] ss:$8 sps:$4 sm:$0xff]  }
  0x42   :  { %3351 = vmatmul.mubr.bf16.vlgmr.msra.gmra.mxu0 %v202_v16  ;;  %v5128_v16 = vld [vmem:[%s7566_s1 + $0x2a0] ss:$8 sps:$4 sm:$0xff]  }
  0x43   :  { %3392 = vmatmul.mubr.bf16.vlgmr.msra.gmra.mxu1 %v204_v17  ;;  %3401 = vmatpush1.bf16.msra.mxu0 %v5050_v18  ;;  %v5131_v17 = vld [vmem:[%s7566_s1 + $0x3a0] ss:$8 sps:$4 sm:$0xff]   ;;  %v5136_v18 = vld [vmem:[%s7566_s1 + $0x294] ss:$8 sps:$4 sm:$0xff]  }
  0x44   :  { %3442 = vmatpush1.bf16.msra.mxu1 %v5053_v19  ;;  %3402 = vmatprep.subr.bf16.mxu0 %v5058_v20  ;;  %v5139_v19 = vld [vmem:[%s7566_s1 + $0x394] ss:$8 sps:$4 sm:$0xff]   ;;  %v5134_v20 = vld [vmem:[%s7566_s1 + $0x290] ss:$8 sps:$4 sm:$0xff]  }
  0x45   :  { %3443 = vmatprep.subr.bf16.mxu1 %v5061_v21  ;;  %3432 = vmatprep.mubr.bf16.mxu0 %v207_v53  ;;  %v5137_v21 = vld [vmem:[%s7566_s1 + $0x390] ss:$8 sps:$4 sm:$0xff]   ;;  %v5168_v53 = vld [vmem:[%s7566_s1 + $0x540] ss:$8 sps:$4 sm:$0xff]  }
  0x46   :  { %3473 = vmatprep.mubr.bf16.mxu1 %v209_v57  ;;  %v5174_v57 = vld [vmem:[%s7566_s1 + $0x530] ss:$8 sps:$4 sm:$0xff]  }
  0x47   :  { %3403 = vmatpush1.bf16.msra.mxu0 %v5056_v22  ;;  %v5142_v22 = vld [vmem:[%s7566_s1 + $0x284] ss:$8 sps:$4 sm:$0xff]  }
  0x48   :  { %3444 = vmatpush1.bf16.msra.mxu1 %v5059_v23  ;;  %3404 = vmatprep.subr.bf16.mxu0 %v5064_v24  ;;  %v5145_v23 = vld [vmem:[%s7566_s1 + $0x384] ss:$8 sps:$4 sm:$0xff]   ;;  %v5140_v24 = vld [vmem:[%s7566_s1 + $0x280] ss:$8 sps:$4 sm:$0xff]  }
  0x49   :  { %3445 = vmatprep.subr.bf16.mxu1 %v5067_v25  ;;  %v5143_v25 = vld [vmem:[%s7566_s1 + $0x380] ss:$8 sps:$4 sm:$0xff]  }
  0x4b   :  { %3405 = vmatpush1.bf16.msra.mxu0 %v5062_v26  ;;  %v5149_v26 = vld [vmem:[%s7566_s1 + $0x474] ss:$8 sps:$4 sm:$0xff]  }
  0x4c   :  { %3446 = vmatpush1.bf16.msra.mxu1 %v5065_v27  ;;  %3406 = vmatprep.subr.bf16.mxu0 %v5070_v28  ;;  %v5152_v27 = vld [vmem:[%s7566_s1 + $0x574] ss:$8 sps:$4 sm:$0xff]   ;;  %v206_v28 = vpack.c.bf16 %v6088_v44, %v6088_v44 }
  0x4d   :  { %3447 = vmatprep.subr.bf16.mxu1 %v5073_v29  ;;  %v208_v29 = vpack.c.bf16 %v6099_v50, %v6099_v50  ;;  %v5167_v50 = vld [vmem:[%s7566_s1 + $0x444] ss:$8 sps:$4 sm:$0xff]  }
  0x4f   :  { %3407 = vmatpush1.bf16.msra.mxu0 %v5068_v30  ;;  %v5147_v30 = vld [vmem:[%s7566_s1 + $0x470] ss:$8 sps:$4 sm:$0xff]  }
  0x50   :  { %3448 = vmatpush1.bf16.msra.mxu1 %v5071_v31  ;;  %3408 = vmatprep.subr.bf16.mxu0 %v5076_v32  ;;  %v5150_v31 = vld [vmem:[%s7566_s1 + $0x570] ss:$8 sps:$4 sm:$0xff]   ;;  %v5155_v32 = vld [vmem:[%s7566_s1 + $0x464] ss:$8 sps:$4 sm:$0xff]  }
  0x51   :  { %3449 = vmatprep.subr.bf16.mxu1 %v5079_v33  ;;  %v20_v33 = vld [vmem:[%s7565_s0 + $0x10] sm:$0xff] }
  0x53   :  { %3409 = vmatpush1.bf16.msra.mxu0 %v5074_v34  ;;  %v5158_v34 = vld [vmem:[%s7566_s1 + $0x564] ss:$8 sps:$4 sm:$0xff]  }
  0x54   :  { %3450 = vmatpush1.bf16.msra.mxu1 %v5077_v35  ;;  %3410 = vmatprep.subr.bf16.mxu0 %v5082_v36  ;;  %v6237_v35 = vrot.slane %v20_v33, %v5939_v49  ;;  %v68_v36 = vcombine.high %v20_v33, %v20_v33 }
  0x55   :  { %3451 = vmatprep.subr.bf16.mxu1 %v5085_v37  ;;  %v5153_v37 = vld [vmem:[%s7566_s1 + $0x460] ss:$8 sps:$4 sm:$0xff]  }
  0x57   :  { %3411 = vmatpush1.bf16.msra.mxu0 %v5080_v38  ;;  %v83_v38 = vcombine.high %v6237_v35, %v6237_v35 }
  0x58   :  { %3452 = vmatpush1.bf16.msra.mxu1 %v5083_v39  ;;  %3412 = vmatprep.subr.bf16.mxu0 %v5088_v40  ;;  %v6245_v39 = vrot.slane %v68_v36, %v5939_v49  ;;  %v5156_v40 = vld [vmem:[%s7566_s1 + $0x560] ss:$8 sps:$4 sm:$0xff]   ;;  %v5234_v36 = vld [vmem:[%s7566_s1 + $0x590] ss:$8 sps:$4 sm:$0xff]  }
  0x59   :  { %3453 = vmatprep.subr.bf16.mxu1 %v5091_v41  ;;  %v5161_v41 = vld [vmem:[%s7566_s1 + $0x454] ss:$8 sps:$4 sm:$0xff]   ;;  %v211_v44 = vpack.c.bf16 %v83_v38, %v83_v38  ;;  %v5242_v38 = vld [vmem:[%s7566_s1 + $0x584] ss:$8 sps:$4 sm:$0xff]  }
  0x5a   :  { %v84_v45 = vcombine.high %v6245_v39, %v6245_v39 }
  0x5b   :  { %3413 = vmatpush1.bf16.msra.mxu0 %v5086_v46  ;;  %v5159_v46 = vld [vmem:[%s7566_s1 + $0x450] ss:$8 sps:$4 sm:$0xff]  }
  0x5c   :  { %3454 = vmatpush1.bf16.msra.mxu1 %v5089_v47  ;;  %3414 = vmatprep.subr.bf16.mxu0 %v5094_v51  ;;  %v213_v47 = vpack.c.bf16 %v84_v45, %v84_v45  ;;  %v5170_v51 = vld [vmem:[%s7566_s1 + $0x544] ss:$8 sps:$4 sm:$0xff]   ;;  %v5246_v45 = vld [vmem:[%s7566_s1 + $0x674] ss:$8 sps:$4 sm:$0xff]  }
  0x5d   :  { %3455 = vmatprep.subr.bf16.mxu1 %v5097_v52  ;;  %v5165_v52 = vld [vmem:[%s7566_s1 + $0x440] ss:$8 sps:$4 sm:$0xff]  }
  0x5f   :  { %3415 = vmatpush1.bf16.msra.mxu0 %v5092_v55  ;;  %v5176_v55 = vld [vmem:[%s7566_s1 + $0x534] ss:$8 sps:$4 sm:$0xff]  }
  0x60   :  { %3456 = vmatpush1.bf16.msra.mxu1 %v5095_v56  ;;  %3416 = vmatprep.subr.bf16.mxu0 %v5100_v58  ;;  %v5171_v56 = vld [vmem:[%s7566_s1 + $0x430] ss:$8 sps:$4 sm:$0xff]   ;;  %v5179_v58 = vld [vmem:[%s7566_s1 + $0x424] ss:$8 sps:$4 sm:$0xff]  }
  0x61   :  { %3457 = vmatprep.subr.bf16.mxu1 %v5103_v59  ;;  %v5182_v59 = vld [vmem:[%s7566_s1 + $0x524] ss:$8 sps:$4 sm:$0xff]  }
  0x63   :  { %3417 = vmatpush2.bf16.msra.mxu0 %v5098_v60  ;;  %v5177_v60 = vld [vmem:[%s7566_s1 + $0x420] ss:$8 sps:$4 sm:$0xff]  }
  0x64   :  { %3458 = vmatpush2.bf16.msra.mxu1 %v5101_v61  ;;  %3418 = vmatprep.subr.bf16.mxu0 %v5106_v62  ;;  %v5180_v61 = vld [vmem:[%s7566_s1 + $0x520] ss:$8 sps:$4 sm:$0xff]   ;;  %v5185_v62 = vld [vmem:[%s7566_s1 + $0x414] ss:$8 sps:$4 sm:$0xff]  }
  0x65   :  { %3459 = vmatprep.subr.bf16.mxu1 %v5109_v63  ;;  %v5188_v63 = vld [vmem:[%s7566_s1 + $0x514] ss:$8 sps:$4 sm:$0xff]  }
  0x67   :  { %3419 = vmatpush2.bf16.msra.mxu0 %v5104_v0  ;;  %v5183_v0 = vld [vmem:[%s7566_s1 + $0x410] ss:$8 sps:$4 sm:$0xff]  }
  0x68   :  { %3460 = vmatpush2.bf16.msra.mxu1 %v5107_v1  ;;  %3420 = vmatprep.subr.bf16.mxu0 %v5112_v2  ;;  %v5186_v1 = vld [vmem:[%s7566_s1 + $0x510] ss:$8 sps:$4 sm:$0xff]   ;;  %v5191_v2 = vld [vmem:[%s7566_s1 + $0x404] ss:$8 sps:$4 sm:$0xff]  }
  0x69   :  { %3461 = vmatprep.subr.bf16.mxu1 %v5115_v3  ;;  %v5194_v3 = vld [vmem:[%s7566_s1 + $0x504] ss:$8 sps:$4 sm:$0xff]  }
  0x6b   :  { %3421 = vmatpush2.bf16.msra.mxu0 %v5110_v4  ;;  %v5189_v4 = vld [vmem:[%s7566_s1 + $0x400] ss:$8 sps:$4 sm:$0xff]  }
  0x6c   :  { %3462 = vmatpush2.bf16.msra.mxu1 %v5113_v5  ;;  %3422 = vmatprep.subr.bf16.mxu0 %v5118_v6  ;;  %v5192_v5 = vld [vmem:[%s7566_s1 + $0x500] ss:$8 sps:$4 sm:$0xff]   ;;  %v5197_v6 = vld [vmem:[%s7566_s1 + $0x4f4] ss:$8 sps:$4 sm:$0xff]  }
  0x6d   :  { %3463 = vmatprep.subr.bf16.mxu1 %v5121_v7  ;;  %v5200_v7 = vld [vmem:[%s7566_s1 + $0x5f4] ss:$8 sps:$4 sm:$0xff]  }
  0x6f   :  { %3423 = vmatpush2.bf16.msra.mxu0 %v5116_v8  ;;  %v5195_v8 = vld [vmem:[%s7566_s1 + $0x4f0] ss:$8 sps:$4 sm:$0xff]  }
  0x70   :  { %3464 = vmatpush2.bf16.msra.mxu1 %v5119_v9  ;;  %3424 = vmatprep.subr.bf16.mxu0 %v5124_v10  ;;  %v5198_v9 = vld [vmem:[%s7566_s1 + $0x5f0] ss:$8 sps:$4 sm:$0xff]   ;;  %v5203_v10 = vld [vmem:[%s7566_s1 + $0x4e4] ss:$8 sps:$4 sm:$0xff]  }
  0x71   :  { %3465 = vmatprep.subr.bf16.mxu1 %v5127_v11  ;;  %v5206_v11 = vld [vmem:[%s7566_s1 + $0x5e4] ss:$8 sps:$4 sm:$0xff]  }
  0x73   :  { %3425 = vmatpush2.bf16.msra.mxu0 %v5122_v12  ;;  %v5201_v12 = vld [vmem:[%s7566_s1 + $0x4e0] ss:$8 sps:$4 sm:$0xff]  }
  0x74   :  { %3466 = vmatpush2.bf16.msra.mxu1 %v5125_v13  ;;  %3426 = vmatprep.subr.bf16.mxu0 %v5130_v14  ;;  %v5204_v13 = vld [vmem:[%s7566_s1 + $0x5e0] ss:$8 sps:$4 sm:$0xff]   ;;  %v5209_v14 = vld [vmem:[%s7566_s1 + $0x4d4] ss:$8 sps:$4 sm:$0xff]  }
  0x75   :  { %3467 = vmatprep.subr.bf16.mxu1 %v5133_v15  ;;  %v5212_v15 = vld [vmem:[%s7566_s1 + $0x5d4] ss:$8 sps:$4 sm:$0xff]  }
  0x77   :  { %3427 = vmatpush2.bf16.msra.mxu0 %v5128_v16  ;;  %v5207_v16 = vld [vmem:[%s7566_s1 + $0x4d0] ss:$8 sps:$4 sm:$0xff]  }
  0x78   :  { %3468 = vmatpush2.bf16.msra.mxu1 %v5131_v17  ;;  %3428 = vmatprep.subr.bf16.mxu0 %v5136_v18  ;;  %v5210_v17 = vld [vmem:[%s7566_s1 + $0x5d0] ss:$8 sps:$4 sm:$0xff]   ;;  %v5215_v18 = vld [vmem:[%s7566_s1 + $0x4c4] ss:$8 sps:$4 sm:$0xff]  }
  0x79   :  { %3469 = vmatprep.subr.bf16.mxu1 %v5139_v19  ;;  %v5218_v19 = vld [vmem:[%s7566_s1 + $0x5c4] ss:$8 sps:$4 sm:$0xff]  }
  0x7b   :  { %3429 = vmatpush2.bf16.msra.mxu0 %v5134_v20  ;;  %v5213_v20 = vld [vmem:[%s7566_s1 + $0x4c0] ss:$8 sps:$4 sm:$0xff]  }
  0x7c   :  { %3470 = vmatpush2.bf16.msra.mxu1 %v5137_v21  ;;  %3430 = vmatprep.subr.bf16.mxu0 %v5142_v22  ;;  %v5216_v21 = vld [vmem:[%s7566_s1 + $0x5c0] ss:$8 sps:$4 sm:$0xff]   ;;  %v5221_v22 = vld [vmem:[%s7566_s1 + $0x4b4] ss:$8 sps:$4 sm:$0xff]  }
  0x7d   :  { %3471 = vmatprep.subr.bf16.mxu1 %v5145_v23  ;;  %v5224_v23 = vld [vmem:[%s7566_s1 + $0x5b4] ss:$8 sps:$4 sm:$0xff]  }
  0x7f   :  { %3431 = vmatpush2.bf16.msra.mxu0 %v5140_v24  ;;  %v5219_v24 = vld [vmem:[%s7566_s1 + $0x4b0] ss:$8 sps:$4 sm:$0xff]  }
  0x80   :  { %3472 = vmatpush2.bf16.msra.mxu1 %v5143_v25  ;;  %3482 = vmatprep.subr.bf16.mxu0 %v5149_v26  ;;  %v5222_v25 = vld [vmem:[%s7566_s1 + $0x5b0] ss:$8 sps:$4 sm:$0xff]   ;;  %v5227_v26 = vld [vmem:[%s7566_s1 + $0x4a4] ss:$8 sps:$4 sm:$0xff]  }
  0x81   :  { %3523 = vmatprep.subr.bf16.mxu1 %v5152_v27  ;;  %v5230_v27 = vld [vmem:[%s7566_s1 + $0x5a4] ss:$8 sps:$4 sm:$0xff]  }
  0x82   :  { %3433 = vmatmul.mubr.bf16.vlgmr.msra.gmra.mxu0 %v206_v28  ;;  %v5225_v28 = vld [vmem:[%s7566_s1 + $0x4a0] ss:$8 sps:$4 sm:$0xff]  }
  0x83   :  { %3474 = vmatmul.mubr.bf16.vlgmr.msra.gmra.mxu1 %v208_v29  ;;  %3483 = vmatpush1.bf16.msra.mxu0 %v5147_v30  ;;  %v21_v29 = vld [vmem:[%s7565_s0 + $0x18] sm:$0xff]  ;;  %v5228_v30 = vld [vmem:[%s7566_s1 + $0x5a0] ss:$8 sps:$4 sm:$0xff]  }
  0x84   :  { %3524 = vmatpush1.bf16.msra.mxu1 %v5150_v31  ;;  %3484 = vmatprep.subr.bf16.mxu0 %v5155_v32  ;;  %v5233_v31 = vld [vmem:[%s7566_s1 + $0x494] ss:$8 sps:$4 sm:$0xff]   ;;  %v85_v33 = vcombine.high %v21_v29, %v21_v29 }
  0x85   :  { %3525 = vmatprep.subr.bf16.mxu1 %v5158_v34  ;;  %3514 = vmatprep.mubr.bf16.mxu0 %v211_v44  ;;  %v5236_v32 = vld [vmem:[%s7566_s1 + $0x594] ss:$8 sps:$4 sm:$0xff]   ;;  %v5231_v34 = vld [vmem:[%s7566_s1 + $0x490] ss:$8 sps:$4 sm:$0xff]   ;;  %v5240_v44 = vld [vmem:[%s7566_s1 + $0x580] ss:$8 sps:$4 sm:$0xff]  }
  0x86   :  { %3555 = vmatprep.mubr.bf16.mxu1 %v213_v47 }
  0x87   :  { %3485 = vmatpush1.bf16.msra.mxu0 %v5153_v37  ;;  %v5239_v37 = vld [vmem:[%s7566_s1 + $0x484] ss:$8 sps:$4 sm:$0xff]  }
  0x88   :  { %3526 = vmatpush1.bf16.msra.mxu1 %v5156_v40  ;;  %3486 = vmatprep.subr.bf16.mxu0 %v5161_v41  ;;  %v6418_v40 = vrot.slane %v21_v29, %v5939_v49  ;;  %v6421_v41 = vrot.slane %v85_v33, %v5939_v49  ;;  %v5307_v29 = vld [vmem:[%s7566_s1 + $0x7d0] ss:$8 sps:$4 sm:$0xff]   ;;  %v5313_v33 = vld [vmem:[%s7566_s1 + $0x7c0] ss:$8 sps:$4 sm:$0xff]  }
  0x89   :  { %3527 = vmatprep.subr.bf16.mxu1 %v5164_v42  ;;  %v5237_v42 = vld [vmem:[%s7566_s1 + $0x480] ss:$8 sps:$4 sm:$0xff]  }
  0x8a   :  { %v100_v47 = vcombine.high %v6418_v40, %v6418_v40 }
  0x8b   :  { %3487 = vmatpush1.bf16.msra.mxu0 %v5159_v46  ;;  %v5249_v46 = vld [vmem:[%s7566_s1 + $0x774] ss:$8 sps:$4 sm:$0xff]  }
  0x8c   :  { %3528 = vmatpush1.bf16.msra.mxu1 %v5162_v48  ;;  %3488 = vmatprep.subr.bf16.mxu0 %v5167_v50  ;;  %v101_v48 = vcombine.high %v6421_v41, %v6421_v41  ;;  %v210_v50 = vpack.c.bf16 %v6237_v35, %v6237_v35  ;;  %v5255_v35 = vld [vmem:[%s7566_s1 + $0x764] ss:$8 sps:$4 sm:$0xff]  }
  0x8d   :  { %3529 = vmatprep.subr.bf16.mxu1 %v5170_v51  ;;  %v212_v51 = vpack.c.bf16 %v6245_v39, %v6245_v39  ;;  %v215_v39 = vpack.c.bf16 %v100_v47, %v100_v47  ;;  %v5325_v47 = vld [vmem:[%s7566_s1 + $0x7a0] ss:$8 sps:$4 sm:$0xff]  }
  0x8f   :  { %3489 = vmatpush1.bf16.msra.mxu0 %v5165_v52  ;;  %v5244_v52 = vld [vmem:[%s7566_s1 + $0x670] ss:$8 sps:$4 sm:$0xff]  }
  0x90   :  { %3530 = vmatpush1.bf16.msra.mxu1 %v5168_v53  ;;  %3490 = vmatprep.subr.bf16.mxu0 %v5173_v54  ;;  %v5247_v53 = vld [vmem:[%s7566_s1 + $0x770] ss:$8 sps:$4 sm:$0xff]   ;;  %v5252_v54 = vld [vmem:[%s7566_s1 + $0x664] ss:$8 sps:$4 sm:$0xff]  }
  0x91   :  { %3531 = vmatprep.subr.bf16.mxu1 %v5176_v55  ;;  %v217_v55 = vpack.c.bf16 %v101_v48, %v101_v48  ;;  %v5330_v48 = vld [vmem:[%s7566_s1 + $0x694] ss:$8 sps:$4 sm:$0xff]  }
  0x93   :  { %3491 = vmatpush1.bf16.msra.mxu0 %v5171_v56  ;;  %v5250_v56 = vld [vmem:[%s7566_s1 + $0x660] ss:$8 sps:$4 sm:$0xff]  }
  0x94   :  { %3532 = vmatpush1.bf16.msra.mxu1 %v5174_v57  ;;  %3492 = vmatprep.subr.bf16.mxu0 %v5179_v58  ;;  %v5253_v57 = vld [vmem:[%s7566_s1 + $0x760] ss:$8 sps:$4 sm:$0xff]   ;;  %v5258_v58 = vld [vmem:[%s7566_s1 + $0x654] ss:$8 sps:$4 sm:$0xff]  }
  0x95   :  { %3533 = vmatprep.subr.bf16.mxu1 %v5182_v59  ;;  %v5261_v59 = vld [vmem:[%s7566_s1 + $0x754] ss:$8 sps:$4 sm:$0xff]  }
  0x97   :  { %3493 = vmatpush1.bf16.msra.mxu0 %v5177_v60  ;;  %v5256_v60 = vld [vmem:[%s7566_s1 + $0x650] ss:$8 sps:$4 sm:$0xff]  }
  0x98   :  { %3534 = vmatpush1.bf16.msra.mxu1 %v5180_v61  ;;  %3494 = vmatprep.subr.bf16.mxu0 %v5185_v62  ;;  %v5259_v61 = vld [vmem:[%s7566_s1 + $0x750] ss:$8 sps:$4 sm:$0xff]   ;;  %v5264_v62 = vld [vmem:[%s7566_s1 + $0x644] ss:$8 sps:$4 sm:$0xff]  }
  0x99   :  { %3535 = vmatprep.subr.bf16.mxu1 %v5188_v63  ;;  %v5267_v63 = vld [vmem:[%s7566_s1 + $0x744] ss:$8 sps:$4 sm:$0xff]  }
  0x9b   :  { %3495 = vmatpush1.bf16.msra.mxu0 %v5183_v0  ;;  %v5262_v0 = vld [vmem:[%s7566_s1 + $0x640] ss:$8 sps:$4 sm:$0xff]  }
  0x9c   :  { %3536 = vmatpush1.bf16.msra.mxu1 %v5186_v1  ;;  %3496 = vmatprep.subr.bf16.mxu0 %v5191_v2  ;;  %v5265_v1 = vld [vmem:[%s7566_s1 + $0x740] ss:$8 sps:$4 sm:$0xff]   ;;  %v5270_v2 = vld [vmem:[%s7566_s1 + $0x634] ss:$8 sps:$4 sm:$0xff]  }
  0x9d   :  { %3537 = vmatprep.subr.bf16.mxu1 %v5194_v3  ;;  %v5273_v3 = vld [vmem:[%s7566_s1 + $0x734] ss:$8 sps:$4 sm:$0xff]  }
  0x9f   :  { %3497 = vmatpush1.bf16.msra.mxu0 %v5189_v4  ;;  %v5268_v4 = vld [vmem:[%s7566_s1 + $0x630] ss:$8 sps:$4 sm:$0xff]  }
  0xa0   :  { %3538 = vmatpush1.bf16.msra.mxu1 %v5192_v5  ;;  %3498 = vmatprep.subr.bf16.mxu0 %v5197_v6  ;;  %v5271_v5 = vld [vmem:[%s7566_s1 + $0x730] ss:$8 sps:$4 sm:$0xff]   ;;  %v5276_v6 = vld [vmem:[%s7566_s1 + $0x624] ss:$8 sps:$4 sm:$0xff]  }
  0xa1   :  { %3539 = vmatprep.subr.bf16.mxu1 %v5200_v7  ;;  %v5279_v7 = vld [vmem:[%s7566_s1 + $0x724] ss:$8 sps:$4 sm:$0xff]  }
  0xa3   :  { %3499 = vmatpush2.bf16.msra.mxu0 %v5195_v8  ;;  %v5274_v8 = vld [vmem:[%s7566_s1 + $0x620] ss:$8 sps:$4 sm:$0xff]  }
  0xa4   :  { %3540 = vmatpush2.bf16.msra.mxu1 %v5198_v9  ;;  %3500 = vmatprep.subr.bf16.mxu0 %v5203_v10  ;;  %v5277_v9 = vld [vmem:[%s7566_s1 + $0x720] ss:$8 sps:$4 sm:$0xff]   ;;  %v5282_v10 = vld [vmem:[%s7566_s1 + $0x614] ss:$8 sps:$4 sm:$0xff]  }
  0xa5   :  { %3541 = vmatprep.subr.bf16.mxu1 %v5206_v11  ;;  %v5285_v11 = vld [vmem:[%s7566_s1 + $0x714] ss:$8 sps:$4 sm:$0xff]  }
  0xa7   :  { %3501 = vmatpush2.bf16.msra.mxu0 %v5201_v12  ;;  %v5280_v12 = vld [vmem:[%s7566_s1 + $0x610] ss:$8 sps:$4 sm:$0xff]  }
  0xa8   :  { %3542 = vmatpush2.bf16.msra.mxu1 %v5204_v13  ;;  %3502 = vmatprep.subr.bf16.mxu0 %v5209_v14  ;;  %v5283_v13 = vld [vmem:[%s7566_s1 + $0x710] ss:$8 sps:$4 sm:$0xff]   ;;  %v5288_v14 = vld [vmem:[%s7566_s1 + $0x604] ss:$8 sps:$4 sm:$0xff]  }
  0xa9   :  { %3543 = vmatprep.subr.bf16.mxu1 %v5212_v15  ;;  %v5291_v15 = vld [vmem:[%s7566_s1 + $0x704] ss:$8 sps:$4 sm:$0xff]  }
  0xab   :  { %3503 = vmatpush2.bf16.msra.mxu0 %v5207_v16  ;;  %v5286_v16 = vld [vmem:[%s7566_s1 + $0x600] ss:$8 sps:$4 sm:$0xff]  }
  0xac   :  { %3544 = vmatpush2.bf16.msra.mxu1 %v5210_v17  ;;  %3504 = vmatprep.subr.bf16.mxu0 %v5215_v18  ;;  %v5289_v17 = vld [vmem:[%s7566_s1 + $0x700] ss:$8 sps:$4 sm:$0xff]   ;;  %v5294_v18 = vld [vmem:[%s7566_s1 + $0x6f4] ss:$8 sps:$4 sm:$0xff]  }
  0xad   :  { %3545 = vmatprep.subr.bf16.mxu1 %v5218_v19  ;;  %v5297_v19 = vld [vmem:[%s7566_s1 + $0x7f4] ss:$8 sps:$4 sm:$0xff]  }
  0xaf   :  { %3505 = vmatpush2.bf16.msra.mxu0 %v5213_v20  ;;  %v5292_v20 = vld [vmem:[%s7566_s1 + $0x6f0] ss:$8 sps:$4 sm:$0xff]  }
  0xb0   :  { %3546 = vmatpush2.bf16.msra.mxu1 %v5216_v21  ;;  %3506 = vmatprep.subr.bf16.mxu0 %v5221_v22  ;;  %v5295_v21 = vld [vmem:[%s7566_s1 + $0x7f0] ss:$8 sps:$4 sm:$0xff]   ;;  %v5300_v22 = vld [vmem:[%s7566_s1 + $0x6e4] ss:$8 sps:$4 sm:$0xff]  }
  0xb1   :  { %3547 = vmatprep.subr.bf16.mxu1 %v5224_v23  ;;  %v5303_v23 = vld [vmem:[%s7566_s1 + $0x7e4] ss:$8 sps:$4 sm:$0xff]  }
  0xb3   :  { %3507 = vmatpush2.bf16.msra.mxu0 %v5219_v24  ;;  %v5298_v24 = vld [vmem:[%s7566_s1 + $0x6e0] ss:$8 sps:$4 sm:$0xff]  }
  0xb4   :  { %3548 = vmatpush2.bf16.msra.mxu1 %v5222_v25  ;;  %3508 = vmatprep.subr.bf16.mxu0 %v5227_v26  ;;  %v5301_v25 = vld [vmem:[%s7566_s1 + $0x7e0] ss:$8 sps:$4 sm:$0xff]   ;;  %v5306_v26 = vld [vmem:[%s7566_s1 + $0x6d4] ss:$8 sps:$4 sm:$0xff]  }
  0xb5   :  { %3549 = vmatprep.subr.bf16.mxu1 %v5230_v27  ;;  %v5309_v27 = vld [vmem:[%s7566_s1 + $0x7d4] ss:$8 sps:$4 sm:$0xff]  }
  0xb7   :  { %3509 = vmatpush2.bf16.msra.mxu0 %v5225_v28  ;;  %v5304_v28 = vld [vmem:[%s7566_s1 + $0x6d0] ss:$8 sps:$4 sm:$0xff]  }
  0xb8   :  { %3550 = vmatpush2.bf16.msra.mxu1 %v5228_v30  ;;  %3510 = vmatprep.subr.bf16.mxu0 %v5233_v31  ;;  %v5312_v30 = vld [vmem:[%s7566_s1 + $0x6c4] ss:$8 sps:$4 sm:$0xff]  }
  0xb9   :  { %3551 = vmatprep.subr.bf16.mxu1 %v5236_v32  ;;  %v5315_v31 = vld [vmem:[%s7566_s1 + $0x7c4] ss:$8 sps:$4 sm:$0xff]   ;;  %v5310_v32 = vld [vmem:[%s7566_s1 + $0x6c0] ss:$8 sps:$4 sm:$0xff]  }
  0xbb   :  { %3511 = vmatpush2.bf16.msra.mxu0 %v5231_v34  ;;  %v5318_v34 = vld [vmem:[%s7566_s1 + $0x6b4] ss:$8 sps:$4 sm:$0xff]  }
  0xbc   :  { %3552 = vmatpush2.bf16.msra.mxu1 %v5234_v36  ;;  %3512 = vmatprep.subr.bf16.mxu0 %v5239_v37  ;;  %v5321_v36 = vld [vmem:[%s7566_s1 + $0x7b4] ss:$8 sps:$4 sm:$0xff]   ;;  %v5316_v37 = vld [vmem:[%s7566_s1 + $0x6b0] ss:$8 sps:$4 sm:$0xff]  }
  0xbd   :  { %3553 = vmatprep.subr.bf16.mxu1 %v5242_v38  ;;  %v5319_v38 = vld [vmem:[%s7566_s1 + $0x7b0] ss:$8 sps:$4 sm:$0xff]  }
  0xbf   :  { %3513 = vmatpush2.bf16.msra.mxu0 %v5237_v42  ;;  %v5324_v42 = vld [vmem:[%s7566_s1 + $0x6a4] ss:$8 sps:$4 sm:$0xff]  }
  0xc0   :  { %3554 = vmatpush2.bf16.msra.mxu1 %v5240_v44  ;;  %3564 = vmatprep.subr.bf16.mxu0 %v5246_v45  ;;  %v5327_v44 = vld [vmem:[%s7566_s1 + $0x7a4] ss:$8 sps:$4 sm:$0xff]  }
  0xc1   :  { %3605 = vmatprep.subr.bf16.mxu1 %v5249_v46  ;;  %v22_v45 = vld [vmem:[%s7565_s0 + $0x20] sm:$0xff] }
  0xc2   :  { %3515 = vmatmul.mubr.bf16.vlgmr.msra.gmra.mxu0 %v210_v50  ;;  %v5322_v46 = vld [vmem:[%s7566_s1 + $0x6a0] ss:$8 sps:$4 sm:$0xff]   ;;  %v5333_v50 = vld [vmem:[%s7566_s1 + $0x794] ss:$8 sps:$4 sm:$0xff]  }
  0xc3   :  { %3556 = vmatmul.mubr.bf16.vlgmr.msra.gmra.mxu1 %v212_v51  ;;  %3565 = vmatpush1.bf16.msra.mxu0 %v5244_v52  ;;  %v102_v51 = vcombine.high %v22_v45, %v22_v45  ;;  %v5328_v52 = vld [vmem:[%s7566_s1 + $0x690] ss:$8 sps:$4 sm:$0xff]  }
  0xc4   :  { %3606 = vmatpush1.bf16.msra.mxu1 %v5247_v53  ;;  %3566 = vmatprep.subr.bf16.mxu0 %v5252_v54  ;;  %v5331_v53 = vld [vmem:[%s7566_s1 + $0x790] ss:$8 sps:$4 sm:$0xff]   ;;  %v5336_v54 = vld [vmem:[%s7566_s1 + $0x684] ss:$8 sps:$4 sm:$0xff]  }
  0xc5   :  { %3607 = vmatprep.subr.bf16.mxu1 %v5255_v35  ;;  %3596 = vmatprep.mubr.bf16.mxu0 %v215_v39  ;;  %v5339_v35 = vld [vmem:[%s7566_s1 + $0x784] ss:$8 sps:$4 sm:$0xff]   ;;  %v6627_v39 = vrot.slane %v22_v45, %v5939_v49  ;;  %v5377_v45 = vld [vmem:[%s7566_s1 + $0x810] ss:$8 sps:$4 sm:$0xff]  }
  0xc6   :  { %3637 = vmatprep.mubr.bf16.mxu1 %v217_v55  ;;  %v6630_v55 = vrot.slane %v102_v51, %v5939_v49  ;;  %v5386_v51 = vld [vmem:[%s7566_s1 + $0x900] ss:$8 sps:$4 sm:$0xff]  }
  0xc7   :  { %3567 = vmatpush1.bf16.msra.mxu0 %v5250_v56  ;;  %v5334_v56 = vld [vmem:[%s7566_s1 + $0x680] ss:$8 sps:$4 sm:$0xff]  }
  0xc8   :  { %3608 = vmatpush1.bf16.msra.mxu1 %v5253_v57  ;;  %3568 = vmatprep.subr.bf16.mxu0 %v5258_v58  ;;  %v5337_v57 = vld [vmem:[%s7566_s1 + $0x780] ss:$8 sps:$4 sm:$0xff]  }
  0xc9   :  { %3609 = vmatprep.subr.bf16.mxu1 %v5261_v59  ;;  %v746_v58 = vld [vmem:[%s7567_s2] sm:$0x3]  ;;  %v750_v59 = vsub.s32 0, %v5921_v43 }
  0xcb   :  { %3569 = vmatpush1.bf16.msra.mxu0 %v5256_v60  ;;  %v5343_v60 = vld [vmem:[%s7566_s1 + $0x874] ss:$8 sps:$4 sm:$0xff]  }
  0xcc   :  { %3610 = vmatpush1.bf16.msra.mxu1 %v5259_v61  ;;  %3570 = vmatprep.subr.bf16.mxu0 %v5264_v62  ;;  %v5346_v61 = vld [vmem:[%s7566_s1 + $0x974] ss:$8 sps:$4 sm:$0xff]   ;;  %v754_v62 = vsub.s32 1, %v5921_v43  ;;  %v5344_v43 = vld [vmem:[%s7566_s1 + $0x970] ss:$8 sps:$4 sm:$0xff]  }
  0xcd   :  { %3611 = vmatprep.subr.bf16.mxu1 %v5267_v63  ;;  %v117_v63 = vcombine.high %v6627_v39, %v6627_v39 }
  0xcf   :  { %3571 = vmatpush1.bf16.msra.mxu0 %v5262_v0  ;;  %v118_v0 = vcombine.high %v6630_v55, %v6630_v55 }
  0xd0   :  { %3612 = vmatpush1.bf16.msra.mxu1 %v5265_v1  ;;  %3572 = vmatprep.subr.bf16.mxu0 %v5270_v2  ;;  %v214_v1 = vpack.c.bf16 %v6418_v40, %v6418_v40  ;;  %v216_v2 = vpack.c.bf16 %v6421_v41, %v6421_v41  ;;  %v5349_v40 = vld [vmem:[%s7566_s1 + $0x864] ss:$8 sps:$4 sm:$0xff]  }
  0xd1   :  { %3613 = vmatprep.subr.bf16.mxu1 %v5273_v3  ;;  %v751_v3 = vrot.slane %v746_v58, %v750_v59  ;;  %v5352_v41 = vld [vmem:[%s7566_s1 + $0x964] ss:$8 sps:$4 sm:$0xff]   ;;  %v5398_v59 = vld [vmem:[%s7566_s1 + $0x9e0] ss:$8 sps:$4 sm:$0xff]  }
  0xd3   :  { %3573 = vmatpush1.bf16.msra.mxu0 %v5268_v4  ;;  %v5341_v4 = vld [vmem:[%s7566_s1 + $0x870] ss:$8 sps:$4 sm:$0xff]  }
  0xd4   :  { %3614 = vmatpush1.bf16.msra.mxu1 %v5271_v5  ;;  %3574 = vmatprep.subr.bf16.mxu0 %v5276_v6  ;;  %v755_v5 = vrot.slane %v746_v58, %v754_v62  ;;  %v219_v6 = vpack.c.bf16 %v117_v63, %v117_v63  ;;  %v5395_v58 = vld [vmem:[%s7566_s1 + $0x8e0] ss:$8 sps:$4 sm:$0xff]   ;;  %v5401_v62 = vld [vmem:[%s7566_s1 + $0x8d0] ss:$8 sps:$4 sm:$0xff]  }
  0xd5   :  { %3615 = vmatprep.subr.bf16.mxu1 %v5279_v7  ;;  %v221_v7 = vpack.c.bf16 %v118_v0, %v118_v0  ;;  %v5404_v63 = vld [vmem:[%s7566_s1 + $0x9d0] ss:$8 sps:$4 sm:$0xff]   ;;  %v5409_v0 = vld [vmem:[%s7566_s1 + $0x8c4] ss:$8 sps:$4 sm:$0xff]  }
  0xd7   :  { %3575 = vmatpush1.bf16.msra.mxu0 %v5274_v8 }
  0xd8   :  { %3616 = vmatpush1.bf16.msra.mxu1 %v5277_v9  ;;  %3576 = vmatprep.subr.bf16.mxu0 %v5282_v10  ;;  %v5347_v10 = vld [vmem:[%s7566_s1 + $0x860] ss:$8 sps:$4 sm:$0xff]  }
  0xd9   :  { %3617 = vmatprep.subr.bf16.mxu1 %v5285_v11 }
  0xdb   :  { %3577 = vmatpush1.bf16.msra.mxu0 %v5280_v12  ;;  %v5350_v12 = vld [vmem:[%s7566_s1 + $0x960] ss:$8 sps:$4 sm:$0xff]  }
  0xdc   :  { %3618 = vmatpush1.bf16.msra.mxu1 %v5283_v13  ;;  %3578 = vmatprep.subr.bf16.mxu0 %v5288_v14  ;;  %v5355_v13 = vld [vmem:[%s7566_s1 + $0x854] ss:$8 sps:$4 sm:$0xff]  }
  0xdd   :  { %3619 = vmatprep.subr.bf16.mxu1 %v5291_v15 }
  0xdf   :  { %3579 = vmatpush1.bf16.msra.mxu0 %v5286_v16  ;;  %v5358_v16 = vld [vmem:[%s7566_s1 + $0x954] ss:$8 sps:$4 sm:$0xff]  }
  0xe0   :  { %3620 = vmatpush1.bf16.msra.mxu1 %v5289_v17  ;;  %3580 = vmatprep.subr.bf16.mxu0 %v5294_v18 }
  0xe1   :  { %3621 = vmatprep.subr.bf16.mxu1 %v5297_v19 }
  0xe3   :  { %3581 = vmatpush2.bf16.msra.mxu0 %v5292_v20 }
  0xe4   :  { %3622 = vmatpush2.bf16.msra.mxu1 %v5295_v21  ;;  %3582 = vmatprep.subr.bf16.mxu0 %v5300_v22  ;;  %v5353_v21 = vld [vmem:[%s7566_s1 + $0x850] ss:$8 sps:$4 sm:$0xff]  }
  0xe5   :  { %3623 = vmatprep.subr.bf16.mxu1 %v5303_v23  ;;  %v5356_v22 = vld [vmem:[%s7566_s1 + $0x950] ss:$8 sps:$4 sm:$0xff]  }
  0xe7   :  { %3583 = vmatpush2.bf16.msra.mxu0 %v5298_v24 }
  0xe8   :  { %3624 = vmatpush2.bf16.msra.mxu1 %v5301_v25  ;;  %3584 = vmatprep.subr.bf16.mxu0 %v5306_v26  ;;  %v5361_v26 = vld [vmem:[%s7566_s1 + $0x844] ss:$8 sps:$4 sm:$0xff]  }
  0xe9   :  { %3625 = vmatprep.subr.bf16.mxu1 %v5309_v27  ;;  %v5364_v27 = vld [vmem:[%s7566_s1 + $0x944] ss:$8 sps:$4 sm:$0xff]  }
  0xeb   :  { %3585 = vmatpush2.bf16.msra.mxu0 %v5304_v28  ;;  %v5359_v28 = vld [vmem:[%s7566_s1 + $0x840] ss:$8 sps:$4 sm:$0xff]  }
  0xec   :  { %3626 = vmatpush2.bf16.msra.mxu1 %v5307_v29  ;;  %3586 = vmatprep.subr.bf16.mxu0 %v5312_v30  ;;  %v5362_v29 = vld [vmem:[%s7566_s1 + $0x940] ss:$8 sps:$4 sm:$0xff]   ;;  %v5367_v30 = vld [vmem:[%s7566_s1 + $0x834] ss:$8 sps:$4 sm:$0xff]  }
  0xed   :  { %3627 = vmatprep.subr.bf16.mxu1 %v5315_v31  ;;  %v5370_v31 = vld [vmem:[%s7566_s1 + $0x934] ss:$8 sps:$4 sm:$0xff]  }
  0xef   :  { %3587 = vmatpush2.bf16.msra.mxu0 %v5310_v32  ;;  %v5365_v32 = vld [vmem:[%s7566_s1 + $0x830] ss:$8 sps:$4 sm:$0xff]  }
  0xf0   :  { %3628 = vmatpush2.bf16.msra.mxu1 %v5313_v33  ;;  %3588 = vmatprep.subr.bf16.mxu0 %v5318_v34  ;;  %v5368_v33 = vld [vmem:[%s7566_s1 + $0x930] ss:$8 sps:$4 sm:$0xff]   ;;  %v5373_v34 = vld [vmem:[%s7566_s1 + $0x824] ss:$8 sps:$4 sm:$0xff]  }
  0xf1   :  { %3629 = vmatprep.subr.bf16.mxu1 %v5321_v36  ;;  %v5376_v36 = vld [vmem:[%s7566_s1 + $0x924] ss:$8 sps:$4 sm:$0xff]  }
  0xf3   :  { %3589 = vmatpush2.bf16.msra.mxu0 %v5316_v37  ;;  %v5371_v37 = vld [vmem:[%s7566_s1 + $0x820] ss:$8 sps:$4 sm:$0xff]  }
  0xf4   :  { %3630 = vmatpush2.bf16.msra.mxu1 %v5319_v38  ;;  %3590 = vmatprep.subr.bf16.mxu0 %v5324_v42  ;;  %v5374_v38 = vld [vmem:[%s7566_s1 + $0x920] ss:$8 sps:$4 sm:$0xff]   ;;  %v5379_v42 = vld [vmem:[%s7566_s1 + $0x814] ss:$8 sps:$4 sm:$0xff]  }
  0xf5   :  { %3631 = vmatprep.subr.bf16.mxu1 %v5327_v44  ;;  %v5382_v44 = vld [vmem:[%s7566_s1 + $0x914] ss:$8 sps:$4 sm:$0xff]  }
  0xf7   :  { %3591 = vmatpush2.bf16.msra.mxu0 %v5322_v46  ;;  %v5380_v46 = vld [vmem:[%s7566_s1 + $0x910] ss:$8 sps:$4 sm:$0xff]  }
  0xf8   :  { %3632 = vmatpush2.bf16.msra.mxu1 %v5325_v47  ;;  %3592 = vmatprep.subr.bf16.mxu0 %v5330_v48  ;;  %v5385_v47 = vld [vmem:[%s7566_s1 + $0x804] ss:$8 sps:$4 sm:$0xff]  }
  0xf9   :  { %3633 = vmatprep.subr.bf16.mxu1 %v5333_v50  ;;  %v5388_v48 = vld [vmem:[%s7566_s1 + $0x904] ss:$8 sps:$4 sm:$0xff]   ;;  %v5383_v50 = vld [vmem:[%s7566_s1 + $0x800] ss:$8 sps:$4 sm:$0xff]  }
  0xfb   :  { %3593 = vmatpush2.bf16.msra.mxu0 %v5328_v52  ;;  %v5391_v52 = vld [vmem:[%s7566_s1 + $0x8f4] ss:$8 sps:$4 sm:$0xff]  }
  0xfc   :  { %3634 = vmatpush2.bf16.msra.mxu1 %v5331_v53  ;;  %3594 = vmatprep.subr.bf16.mxu0 %v5336_v54  ;;  %v5394_v53 = vld [vmem:[%s7566_s1 + $0x9f4] ss:$8 sps:$4 sm:$0xff]   ;;  %v5389_v54 = vld [vmem:[%s7566_s1 + $0x8f0] ss:$8 sps:$4 sm:$0xff]  }
  0xfd   :  { %3635 = vmatprep.subr.bf16.mxu1 %v5339_v35  ;;  %v5392_v35 = vld [vmem:[%s7566_s1 + $0x9f0] ss:$8 sps:$4 sm:$0xff]  }
  0xff   :  { %3595 = vmatpush2.bf16.msra.mxu0 %v5334_v56  ;;  %v5397_v56 = vld [vmem:[%s7566_s1 + $0x8e4] ss:$8 sps:$4 sm:$0xff]  }
 0x100   :  { %3636 = vmatpush2.bf16.msra.mxu1 %v5337_v57  ;;  %3646 = vmatprep.subr.bf16.mxu0 %v5343_v60  ;;  %v5400_v57 = vld [vmem:[%s7566_s1 + $0x9e4] ss:$8 sps:$4 sm:$0xff]   ;;  %v5403_v60 = vld [vmem:[%s7566_s1 + $0x8d4] ss:$8 sps:$4 sm:$0xff]  }
 0x101   :  { %3687 = vmatprep.subr.bf16.mxu1 %v5346_v61  ;;  %v5406_v61 = vld [vmem:[%s7566_s1 + $0x9d4] ss:$8 sps:$4 sm:$0xff]  }
 0x102   :  { %v3352_v8 = vpop.f32.mrf.mxu0  ;;  %3597 = vmatmul.mubr.bf16.vlgmr.msra.gmra.mxu0 %v214_v1  ;;  %v5412_v1 = vld [vmem:[%s7566_s1 + $0x9c4] ss:$8 sps:$4 sm:$0xff]  }
 0x103   :  { %v3393_v9 = vpop.f32.mrf.mxu1  ;;  %3638 = vmatmul.mubr.bf16.vlgmr.msra.gmra.mxu1 %v216_v2  ;;  %v3353_v11 = vadd.f32 %v3352_v8, %v751_v3  ;;  %3647 = vmatpush1.bf16.msra.mxu0 %v5341_v4  ;;  %v5407_v2 = vld [vmem:[%s7566_s1 + $0x8c0] ss:$8 sps:$4 sm:$0xff]   ;;  %v5415_v4 = vld [vmem:[%s7566_s1 + $0x8b4] ss:$8 sps:$4 sm:$0xff]  }
 0x104   :  { %3688 = vmatpush1.bf16.msra.mxu1 %v5344_v43  ;;  %v3354_v14 = vpop.f32.mrf.mxu0  ;;  %3648 = vmatprep.subr.bf16.mxu0 %v5349_v40  ;;  %v5410_v3 = vld [vmem:[%s7566_s1 + $0x9c0] ss:$8 sps:$4 sm:$0xff]   ;;  %v5418_v43 = vld [vmem:[%s7566_s1 + $0x9b4] ss:$8 sps:$4 sm:$0xff]   ;;  %v5413_v40 = vld [vmem:[%s7566_s1 + $0x8b0] ss:$8 sps:$4 sm:$0xff]  }
 0x105   :  { %v3395_v15 = vpop.f32.mrf.mxu1  ;;  %3689 = vmatprep.subr.bf16.mxu1 %v5352_v41  ;;  %v6681_v17 = vadd.f32 %v3393_v9, %v3353_v11  ;;  %v3355_v18 = vadd.f32 %v3354_v14, %v755_v5  ;;  %3678 = vmatprep.mubr.bf16.mxu0 %v219_v6  ;;  %v5416_v41 = vld [vmem:[%s7566_s1 + $0x9b0] ss:$8 sps:$4 sm:$0xff]   ;;  %v5421_v5 = vld [vmem:[%s7566_s1 + $0x8a4] ss:$8 sps:$4 sm:$0xff]   ;;  %v5419_v8 = vld [vmem:[%s7566_s1 + $0x8a0] ss:$8 sps:$4 sm:$0xff]  }
 0x106   :  { %3719 = vmatprep.mubr.bf16.mxu1 %v221_v7  ;;  %v3356_v19 = vpop.f32.mrf.mxu0  ;;  %v5424_v6 = vld [vmem:[%s7566_s1 + $0x9a4] ss:$8 sps:$4 sm:$0xff]   ;;  %v5422_v9 = vld [vmem:[%s7566_s1 + $0x9a0] ss:$8 sps:$4 sm:$0xff]   ;;  %v5430_v11 = vld [vmem:[%s7566_s1 + $0x994] ss:$8 sps:$4 sm:$0xff]  }
 0x107   :  { %v3397_v20 = vpop.f32.mrf.mxu1  ;;  %v6689_v23 = vadd.f32 %v3395_v15, %v3355_v18  ;;  %3649 = vmatpush1.bf16.msra.mxu0 %v5347_v10  ;;  %v23_v7 = vld [vmem:[%s7565_s0 + $0x28] sm:$0xff]  ;;  %v5427_v10 = vld [vmem:[%s7566_s1 + $0x894] ss:$8 sps:$4 sm:$0xff]   ;;  %v5428_v14 = vld [vmem:[%s7566_s1 + $0x990] ss:$8 sps:$4 sm:$0xff]  }
 0x108   :  { %3690 = vmatpush1.bf16.msra.mxu1 %v5350_v12  ;;  %v3357_v24 = vpop.f32.mrf.mxu0  ;;  %3650 = vmatprep.subr.bf16.mxu0 %v5355_v13  ;;  %v119_v12 = vcombine.high %v23_v7, %v23_v7  ;;  %v5425_v13 = vld [vmem:[%s7566_s1 + $0x890] ss:$8 sps:$4 sm:$0xff]   ;;  %v5433_v15 = vld [vmem:[%s7566_s1 + $0x884] ss:$8 sps:$4 sm:$0xff]   ;;  %v6845_v18 = vrot.slane %v23_v7, %v5939_v49  ;;  %v5431_v20 = vld [vmem:[%s7566_s1 + $0x880] ss:$8 sps:$4 sm:$0xff]  }
 0x109   :  { %v3398_v25 = vpop.f32.mrf.mxu1  ;;  %3691 = vmatprep.subr.bf16.mxu1 %v5358_v16  ;;  %v5436_v16 = vld [vmem:[%s7566_s1 + $0x984] ss:$8 sps:$4 sm:$0xff]   ;;  %v5443_v24 = vld [vmem:[%s7566_s1 + $0xb74] ss:$8 sps:$4 sm:$0xff]  }
 0x10a   :  { %v6848_v19 = vrot.slane %v119_v12, %v5939_v49  ;;  %v5438_v25 = vld [vmem:[%s7566_s1 + $0xa70] ss:$8 sps:$4 sm:$0xff]  }
 0x10b   :  { %3651 = vmatpush1.bf16.msra.mxu0 %v5353_v21  ;;  %v5434_v21 = vld [vmem:[%s7566_s1 + $0x980] ss:$8 sps:$4 sm:$0xff]  }
 0x10c   :  { %3692 = vmatpush1.bf16.msra.mxu1 %v5356_v22  ;;  %3652 = vmatprep.subr.bf16.mxu0 %v5361_v26  ;;  %v5440_v22 = vld [vmem:[%s7566_s1 + $0xa74] ss:$8 sps:$4 sm:$0xff]   ;;  %v5441_v26 = vld [vmem:[%s7566_s1 + $0xb70] ss:$8 sps:$4 sm:$0xff]  }
 0x10d   :  { %3693 = vmatprep.subr.bf16.mxu1 %v5364_v27  ;;  %v134_v27 = vcombine.high %v6845_v18, %v6845_v18 }
 0x10f   :  { %3653 = vmatpush1.bf16.msra.mxu0 %v5359_v28  ;;  %v135_v28 = vcombine.high %v6848_v19, %v6848_v19 }
 0x110   :  { %3694 = vmatpush1.bf16.msra.mxu1 %v5362_v29  ;;  %3654 = vmatprep.subr.bf16.mxu0 %v5367_v30  ;;  %v218_v29 = vpack.c.bf16 %v6627_v39, %v6627_v39  ;;  %v220_v30 = vpack.c.bf16 %v6630_v55, %v6630_v55  ;;  %v5444_v55 = vld [vmem:[%s7566_s1 + $0xa60] ss:$8 sps:$4 sm:$0xff]  }
 0x111   :  { %3695 = vmatprep.subr.bf16.mxu1 %v5370_v31  ;;  %v5446_v31 = vld [vmem:[%s7566_s1 + $0xa64] ss:$8 sps:$4 sm:$0xff]  }
 0x113   :  { %3655 = vmatpush1.bf16.msra.mxu0 %v5365_v32  ;;  %v5449_v32 = vld [vmem:[%s7566_s1 + $0xb64] ss:$8 sps:$4 sm:$0xff]  }
 0x114   :  { %3696 = vmatpush1.bf16.msra.mxu1 %v5368_v33  ;;  %3656 = vmatprep.subr.bf16.mxu0 %v5373_v34  ;;  %v223_v33 = vpack.c.bf16 %v134_v27, %v134_v27  ;;  %v225_v34 = vpack.c.bf16 %v135_v28, %v135_v28 }
 0x115   :  { %3697 = vmatprep.subr.bf16.mxu1 %v5376_v36 }
 0x117   :  { %3657 = vmatpush1.bf16.msra.mxu0 %v5371_v37 }
 0x118   :  { %3698 = vmatpush1.bf16.msra.mxu1 %v5374_v38  ;;  %3658 = vmatprep.subr.bf16.mxu0 %v5379_v42  ;;  %v5447_v38 = vld [vmem:[%s7566_s1 + $0xb60] ss:$8 sps:$4 sm:$0xff]  }
 0x119   :  { %3699 = vmatprep.subr.bf16.mxu1 %v5382_v44 }
 0x11b   :  { %3659 = vmatpush1.bf16.msra.mxu0 %v5377_v45 }
 0x11c   :  { %3700 = vmatpush1.bf16.msra.mxu1 %v5380_v46  ;;  %3660 = vmatprep.subr.bf16.mxu0 %v5385_v47 }
 0x11d   :  { %3701 = vmatprep.subr.bf16.mxu1 %v5388_v48 }
 0x11f   :  { %3661 = vmatpush1.bf16.msra.mxu0 %v5383_v50 }
 0x120   :  { %3702 = vmatpush1.bf16.msra.mxu1 %v5386_v51  ;;  %3662 = vmatprep.subr.bf16.mxu0 %v5391_v52 }
 0x121   :  { %3703 = vmatprep.subr.bf16.mxu1 %v5394_v53 }
 0x123   :  { %3663 = vmatpush2.bf16.msra.mxu0 %v5389_v54 }
 0x124   :  { %3704 = vmatpush2.bf16.msra.mxu1 %v5392_v35  ;;  %3664 = vmatprep.subr.bf16.mxu0 %v5397_v56 }
 0x125   :  { %3705 = vmatprep.subr.bf16.mxu1 %v5400_v57 }
 0x127   :  { %3665 = vmatpush2.bf16.msra.mxu0 %v5395_v58 }
 0x128   :  { %3706 = vmatpush2.bf16.msra.mxu1 %v5398_v59  ;;  %3666 = vmatprep.subr.bf16.mxu0 %v5403_v60 }
 0x129   :  { %3707 = vmatprep.subr.bf16.mxu1 %v5406_v61 }
 0x12b   :  { %3667 = vmatpush2.bf16.msra.mxu0 %v5401_v62 }
 0x12c   :  { %3708 = vmatpush2.bf16.msra.mxu1 %v5404_v63  ;;  %3668 = vmatprep.subr.bf16.mxu0 %v5409_v0 }
 0x12d   :  { %3709 = vmatprep.subr.bf16.mxu1 %v5412_v1 }
 0x12f   :  { %3669 = vmatpush2.bf16.msra.mxu0 %v5407_v2 }
 0x130   :  { %3710 = vmatpush2.bf16.msra.mxu1 %v5410_v3  ;;  %3670 = vmatprep.subr.bf16.mxu0 %v5415_v4 }
 0x131   :  { %3711 = vmatprep.subr.bf16.mxu1 %v5418_v43 }
 0x133   :  { %3671 = vmatpush2.bf16.msra.mxu0 %v5413_v40 }
 0x134   :  { %3712 = vmatpush2.bf16.msra.mxu1 %v5416_v41  ;;  %3672 = vmatprep.subr.bf16.mxu0 %v5421_v5 }
 0x135   :  { %3713 = vmatprep.subr.bf16.mxu1 %v5424_v6 }
 0x137   :  { %3673 = vmatpush2.bf16.msra.mxu0 %v5419_v8 }
 0x138   :  { %3714 = vmatpush2.bf16.msra.mxu1 %v5422_v9  ;;  %3674 = vmatprep.subr.bf16.mxu0 %v5427_v10 }
 0x139   :  { %3715 = vmatprep.subr.bf16.mxu1 %v5430_v11 }
 0x13b   :  { %3675 = vmatpush2.bf16.msra.mxu0 %v5425_v13 }
 0x13c   :  { %3716 = vmatpush2.bf16.msra.mxu1 %v5428_v14  ;;  %3676 = vmatprep.subr.bf16.mxu0 %v5433_v15 }
 0x13d   :  { %3717 = vmatprep.subr.bf16.mxu1 %v5436_v16 }
 0x13f   :  { %3677 = vmatpush2.bf16.msra.mxu0 %v5431_v20 }
 0x140   :  { %3718 = vmatpush2.bf16.msra.mxu1 %v5434_v21  ;;  %3728 = vmatprep.subr.bf16.mxu0 %v5440_v22 }
 0x141   :  { %3769 = vmatprep.subr.bf16.mxu1 %v5443_v24 }
 0x142   :  { %v3434_v36 = vpop.f32.mrf.mxu0  ;;  %3679 = vmatmul.mubr.bf16.vlgmr.msra.gmra.mxu0 %v218_v29 }
 0x143   :  { %v3475_v37 = vpop.f32.mrf.mxu1  ;;  %3720 = vmatmul.mubr.bf16.vlgmr.msra.gmra.mxu1 %v220_v30  ;;  %v3435_v39 = vadd.f32 %v3434_v36, %v6681_v17  ;;  %3729 = vmatpush1.bf16.msra.mxu0 %v5438_v25 }
 0x144   :  { %3770 = vmatpush1.bf16.msra.mxu1 %v5441_v26 }
 0x145   :  { %9 = vsyncpa [#allocation3], 0  ;;  %v3436_v42 = vpop.f32.mrf.mxu0  ;;  %v3477_v44 = vpop.f32.mrf.mxu1  ;;  %3730 = vmatprep.subr.bf16.mxu0 %v5446_v31  ;;  %3771 = vmatprep.subr.bf16.mxu1 %v5449_v32  ;;  %v5452_v45 = vld [vmem:[%s7566_s1 + $0xa54] ss:$8 sps:$4 sm:$0xff]   ;;  %v6895_v46 = vadd.f32 %v3475_v37, %v3435_v39  ;;  %v5450_v52 = vld [vmem:[%s7566_s1 + $0xa50] ss:$8 sps:$4 sm:$0xff]  }
 0x146   :  { %v5455_v17 = vld [vmem:[%s7566_s1 + $0xb54] ss:$8 sps:$4 sm:$0xff]   ;;  %v3437_v47 = vadd.f32 %v3436_v42, %v6689_v23  ;;  %3760 = vmatprep.mubr.bf16.mxu0 %v223_v33  ;;  %3801 = vmatprep.mubr.bf16.mxu1 %v225_v34  ;;  %v5453_v53 = vld [vmem:[%s7566_s1 + $0xb50] ss:$8 sps:$4 sm:$0xff]   ;;  %v5458_v23 = vld [vmem:[%s7566_s1 + $0xa44] ss:$8 sps:$4 sm:$0xff]  }
 0x147   :  { %v3438_v48 = vpop.f32.mrf.mxu0  ;;  %v3479_v50 = vpop.f32.mrf.mxu1  ;;  %3731 = vmatpush1.bf16.msra.mxu0 %v5444_v55  ;;  %v5461_v56 = vld [vmem:[%s7566_s1 + $0xb44] ss:$8 sps:$4 sm:$0xff]   ;;  %v5456_v57 = vld [vmem:[%s7566_s1 + $0xa40] ss:$8 sps:$4 sm:$0xff]   ;;  %v5464_v59 = vld [vmem:[%s7566_s1 + $0xa34] ss:$8 sps:$4 sm:$0xff]  }
 0x148   :  { %v6898_v51 = vadd.f32 %v3477_v44, %v3437_v47  ;;  %3772 = vmatpush1.bf16.msra.mxu1 %v5447_v38  ;;  %3732 = vmatprep.subr.bf16.mxu0 %v5452_v45  ;;  %v5459_v58 = vld [vmem:[%s7566_s1 + $0xb40] ss:$8 sps:$4 sm:$0xff]   ;;  %v5467_v60 = vld [vmem:[%s7566_s1 + $0xb34] ss:$8 sps:$4 sm:$0xff]   ;;  %v5462_v61 = vld [vmem:[%s7566_s1 + $0xa30] ss:$8 sps:$4 sm:$0xff]  }
 0x149   :  { %v3439_v54 = vpop.f32.mrf.mxu0  ;;  %v3480_v35 = vpop.f32.mrf.mxu1  ;;  %3773 = vmatprep.subr.bf16.mxu1 %v5455_v17  ;;  %v5465_v62 = vld [vmem:[%s7566_s1 + $0xb30] ss:$8 sps:$4 sm:$0xff]   ;;  %v5470_v63 = vld [vmem:[%s7566_s1 + $0xa24] ss:$8 sps:$4 sm:$0xff]   ;;  %v5468_v1 = vld [vmem:[%s7566_s1 + $0xa20] ss:$8 sps:$4 sm:$0xff]  }
 0x14a   :  { %v5473_v0 = vld [vmem:[%s7566_s1 + $0xb24] ss:$8 sps:$4 sm:$0xff]   ;;  %v5471_v2 = vld [vmem:[%s7566_s1 + $0xb20] ss:$8 sps:$4 sm:$0xff]   ;;  %v5476_v3 = vld [vmem:[%s7566_s1 + $0xa14] ss:$8 sps:$4 sm:$0xff]  }
 0x14b   :  { %3733 = vmatpush1.bf16.msra.mxu0 %v5450_v52  ;;  %v5479_v4 = vld [vmem:[%s7566_s1 + $0xb14] ss:$8 sps:$4 sm:$0xff]   ;;  %v5474_v43 = vld [vmem:[%s7566_s1 + $0xa10] ss:$8 sps:$4 sm:$0xff]   ;;  %v5482_v41 = vld [vmem:[%s7566_s1 + $0xa04] ss:$8 sps:$4 sm:$0xff]  }
 0x14c   :  { %3774 = vmatpush1.bf16.msra.mxu1 %v5453_v53  ;;  %3734 = vmatprep.subr.bf16.mxu0 %v5458_v23  ;;  %v5477_v40 = vld [vmem:[%s7566_s1 + $0xb10] ss:$8 sps:$4 sm:$0xff]   ;;  %v5485_v5 = vld [vmem:[%s7566_s1 + $0xb04] ss:$8 sps:$4 sm:$0xff]   ;;  %v5480_v6 = vld [vmem:[%s7566_s1 + $0xa00] ss:$8 sps:$4 sm:$0xff]  }
 0x14d   :  { %3775 = vmatprep.subr.bf16.mxu1 %v5461_v56  ;;  %v5483_v7 = vld [vmem:[%s7566_s1 + $0xb00] ss:$8 sps:$4 sm:$0xff]   ;;  %v5488_v8 = vld [vmem:[%s7566_s1 + $0xaf4] ss:$8 sps:$4 sm:$0xff]   ;;  %v5486_v10 = vld [vmem:[%s7566_s1 + $0xaf0] ss:$8 sps:$4 sm:$0xff]   ;;  %v222_v56 = vpack.c.bf16 %v6845_v18, %v6845_v18 }
 0x14e   :  { %v5491_v9 = vld [vmem:[%s7566_s1 + $0xbf4] ss:$8 sps:$4 sm:$0xff]   ;;  %v5489_v11 = vld [vmem:[%s7566_s1 + $0xbf0] ss:$8 sps:$4 sm:$0xff]   ;;  %v5494_v12 = vld [vmem:[%s7566_s1 + $0xae4] ss:$8 sps:$4 sm:$0xff]  }
 0x14f   :  { %3735 = vmatpush1.bf16.msra.mxu0 %v5456_v57  ;;  %v5497_v13 = vld [vmem:[%s7566_s1 + $0xbe4] ss:$8 sps:$4 sm:$0xff]   ;;  %v5492_v14 = vld [vmem:[%s7566_s1 + $0xae0] ss:$8 sps:$4 sm:$0xff]   ;;  %v5500_v16 = vld [vmem:[%s7566_s1 + $0xad4] ss:$8 sps:$4 sm:$0xff]   ;;  %v224_v57 = vpack.c.bf16 %v6848_v19, %v6848_v19 }
 0x150   :  { %3776 = vmatpush1.bf16.msra.mxu1 %v5459_v58  ;;  %3736 = vmatprep.subr.bf16.mxu0 %v5464_v59  ;;  %v5495_v15 = vld [vmem:[%s7566_s1 + $0xbe0] ss:$8 sps:$4 sm:$0xff]   ;;  %v5503_v20 = vld [vmem:[%s7566_s1 + $0xbd4] ss:$8 sps:$4 sm:$0xff]   ;;  %v5498_v21 = vld [vmem:[%s7566_s1 + $0xad0] ss:$8 sps:$4 sm:$0xff]  }
 0x151   :  { %3777 = vmatprep.subr.bf16.mxu1 %v5467_v60  ;;  %v5501_v22 = vld [vmem:[%s7566_s1 + $0xbd0] ss:$8 sps:$4 sm:$0xff]   ;;  %v5506_v24 = vld [vmem:[%s7566_s1 + $0xac4] ss:$8 sps:$4 sm:$0xff]   ;;  %v5504_v26 = vld [vmem:[%s7566_s1 + $0xac0] ss:$8 sps:$4 sm:$0xff]  }
 0x152   :  { %v5509_v25 = vld [vmem:[%s7566_s1 + $0xbc4] ss:$8 sps:$4 sm:$0xff]   ;;  %v5507_v27 = vld [vmem:[%s7566_s1 + $0xbc0] ss:$8 sps:$4 sm:$0xff]   ;;  %v5512_v28 = vld [vmem:[%s7566_s1 + $0xab4] ss:$8 sps:$4 sm:$0xff]  }
 0x153   :  { %3737 = vmatpush1.bf16.msra.mxu0 %v5462_v61  ;;  %v5515_v29 = vld [vmem:[%s7566_s1 + $0xbb4] ss:$8 sps:$4 sm:$0xff]   ;;  %v5510_v30 = vld [vmem:[%s7566_s1 + $0xab0] ss:$8 sps:$4 sm:$0xff]   ;;  %v5518_v32 = vld [vmem:[%s7566_s1 + $0xaa4] ss:$8 sps:$4 sm:$0xff]  }
 0x154   :  { %3778 = vmatpush1.bf16.msra.mxu1 %v5465_v62  ;;  %3738 = vmatprep.subr.bf16.mxu0 %v5470_v63  ;;  %v5513_v31 = vld [vmem:[%s7566_s1 + $0xbb0] ss:$8 sps:$4 sm:$0xff]   ;;  %v5521_v33 = vld [vmem:[%s7566_s1 + $0xba4] ss:$8 sps:$4 sm:$0xff]   ;;  %v5516_v36 = vld [vmem:[%s7566_s1 + $0xaa0] ss:$8 sps:$4 sm:$0xff]  }
 0x155   :  { %3779 = vmatprep.subr.bf16.mxu1 %v5473_v0  ;;  %v24_v34 = vld [vmem:[%s7565_s0 + $0x30] sm:$0xff]  ;;  %v5519_v37 = vld [vmem:[%s7566_s1 + $0xba0] ss:$8 sps:$4 sm:$0xff]   ;;  %v5530_v45 = vld [vmem:[%s7566_s1 + $0xa84] ss:$8 sps:$4 sm:$0xff]   ;;  %vm5765_vm0 = vmmov 0  }
 0x156   :  { %v5524_v39 = vld [vmem:[%s7566_s1 + $0xa94] ss:$8 sps:$4 sm:$0xff]   ;;  %v136_v38 = vcombine.high %v24_v34, %v24_v34  ;;  %v5522_v42 = vld [vmem:[%s7566_s1 + $0xa90] ss:$8 sps:$4 sm:$0xff]   ;;  %v5533_v17 = vld [vmem:[%s7566_s1 + $0xb84] ss:$8 sps:$4 sm:$0xff]   ;;  %v7060_v47 = vrot.slane %v24_v34, %v5939_v49 }
 0x157   :  { %3739 = vmatpush1.bf16.msra.mxu0 %v5468_v1  ;;  %v5527_v55 = vld [vmem:[%s7566_s1 + $0xb94] ss:$8 sps:$4 sm:$0xff]   ;;  %v5525_v44 = vld [vmem:[%s7566_s1 + $0xb90] ss:$8 sps:$4 sm:$0xff]   ;;  %v5528_v50 = vld [vmem:[%s7566_s1 + $0xa80] ss:$8 sps:$4 sm:$0xff]  }
 0x158   :  { %3780 = vmatpush1.bf16.msra.mxu1 %v5471_v2  ;;  %3740 = vmatprep.subr.bf16.mxu0 %v5476_v3  ;;  %v7063_v48 = vrot.slane %v136_v38, %v5939_v49  ;;  %v5531_v52 = vld [vmem:[%s7566_s1 + $0xb80] ss:$8 sps:$4 sm:$0xff]   ;;  %v5537_v53 = vld [vmem:[%s7566_s1 + $0xc74] ss:$8 sps:$4 sm:$0xff]   ;;  %v151_v35 = vcombine.high %v7060_v47, %v7060_v47  ;;  %v5535_v58 = vld [vmem:[%s7566_s1 + $0xc70] ss:$8 sps:$4 sm:$0xff]  }
 0x159   :  { %3781 = vmatprep.subr.bf16.mxu1 %v5479_v4  ;;  %v5540_v54 = vld [vmem:[%s7566_s1 + $0xd74] ss:$8 sps:$4 sm:$0xff]   ;;  %v5538_v59 = vld [vmem:[%s7566_s1 + $0xd70] ss:$8 sps:$4 sm:$0xff]   ;;  %v5543_v60 = vld [vmem:[%s7566_s1 + $0xc64] ss:$8 sps:$4 sm:$0xff]  }
 0x15a   :  { %v152_v23 = vcombine.high %v7063_v48, %v7063_v48  ;;  %v5546_v18 = vld [vmem:[%s7566_s1 + $0xd64] ss:$8 sps:$4 sm:$0xff]   ;;  %v227_v19 = vpack.c.bf16 %v151_v35, %v151_v35  ;;  %v5541_v1 = vld [vmem:[%s7566_s1 + $0xc60] ss:$8 sps:$4 sm:$0xff]   ;;  %vm3983_vm1 = vcmask 261120   ;;  %s5769_s24 = smov 96  }
 0x15b   :  { %3741 = vmatpush1.bf16.msra.mxu0 %v5474_v43  ;;  %v5544_v2 = vld [vmem:[%s7566_s1 + $0xd60] ss:$8 sps:$4 sm:$0xff]   ;;  %v5549_v43 = vld [vmem:[%s7566_s1 + $0xc54] ss:$8 sps:$4 sm:$0xff]   ;;  %v5591_v38 = vld [vmem:[%s7566_s1 + $0xce4] ss:$8 sps:$4 sm:$0xff]  }
 0x15c   :  { %3782 = vmatpush1.bf16.msra.mxu1 %v5477_v40  ;;  %3742 = vmatprep.subr.bf16.mxu0 %v5482_v41  ;;  %v229_v61 = vpack.c.bf16 %v152_v23, %v152_v23  ;;  %v5580_v34 = vld [vmem:[%s7566_s1 + $0xd00] ss:$8 sps:$4 sm:$0xff]   ;;  %v5606_v35 = vld [vmem:[%s7566_s1 + $0xdc4] ss:$8 sps:$4 sm:$0xff]   ;;  %s5770_s25 = smov 64   ;;  %s5778_s26 = smov [#allocation2]  }
 0x15d   :  { %3783 = vmatprep.subr.bf16.mxu1 %v5485_v5  ;;  %v5601_v23 = vld [vmem:[%s7566_s1 + $0xcc0] ss:$8 sps:$4 sm:$0xff]   ;;  %s4338_s27 = sshll.u32 %s5778_s26, 4  ;;  %vm4330_vm2 = vcmask 123904   ;;  %s4339_s27 = int_to_ptr.vmem [resolvable:$true] %s4338_s27 }
 0x15e   :  { %s5741_s28 = scalar_lea.vmem %s4339_s27, 32  ;;  %p5746_p1 = scmp.lt.s32.totalorder %s4339_s27, %s4339_s27 }
 0x15f   :  { %3743 = vmatpush1.bf16.msra.mxu0 %v5480_v6  ;;  %p5742_p0 = scmp.ne.s32.totalorder %s4339_s27, %s5741_s28  ;;  %p5747_p2 = scmp.lt.s32.totalorder %s5741_s28, %s5741_s28 }
 0x160   :  { %3784 = vmatpush1.bf16.msra.mxu1 %v5483_v7  ;;  %3744 = vmatprep.subr.bf16.mxu0 %v5488_v8  ;;  %v5547_v8 = vld [vmem:[%s7566_s1 + $0xc50] ss:$8 sps:$4 sm:$0xff]  }
 0x161   :  { %3785 = vmatprep.subr.bf16.mxu1 %v5491_v9  ;;  %v5550_v9 = vld [vmem:[%s7566_s1 + $0xd50] ss:$8 sps:$4 sm:$0xff]   ;;  %p5748_p3 = por %p5747_p2, %p5746_p1 }
 0x163   :  { %3745 = vmatpush2.bf16.msra.mxu0 %v5486_v10  ;;  %p5749_p4 = pnand %p5748_p3, %p5742_p0 }
 0x164   :  { %3786 = vmatpush2.bf16.msra.mxu1 %v5489_v11  ;;  %3746 = vmatprep.subr.bf16.mxu0 %v5494_v12  ;;  %v5558_v12 = vld [vmem:[%s7566_s1 + $0xd44] ss:$8 sps:$4 sm:$0xff]  }
 0x165   :  { %3787 = vmatprep.subr.bf16.mxu1 %v5497_v13  ;;  %v5553_v13 = vld [vmem:[%s7566_s1 + $0xc40] ss:$8 sps:$4 sm:$0xff]  }
 0x167   :  { %3747 = vmatpush2.bf16.msra.mxu0 %v5492_v14  ;;  %v5556_v14 = vld [vmem:[%s7566_s1 + $0xd40] ss:$8 sps:$4 sm:$0xff]  }
 0x168   :  { %3788 = vmatpush2.bf16.msra.mxu1 %v5495_v15  ;;  %3748 = vmatprep.subr.bf16.mxu0 %v5500_v16  ;;  %v5561_v15 = vld [vmem:[%s7566_s1 + $0xc34] ss:$8 sps:$4 sm:$0xff]  }
 0x169   :  { %3789 = vmatprep.subr.bf16.mxu1 %v5503_v20  ;;  %v5564_v16 = vld [vmem:[%s7566_s1 + $0xd34] ss:$8 sps:$4 sm:$0xff]   ;;  %v5559_v20 = vld [vmem:[%s7566_s1 + $0xc30] ss:$8 sps:$4 sm:$0xff]  }
 0x16b   :  { %3749 = vmatpush2.bf16.msra.mxu0 %v5498_v21  ;;  %v5562_v21 = vld [vmem:[%s7566_s1 + $0xd30] ss:$8 sps:$4 sm:$0xff]  }
 0x16c   :  { %3790 = vmatpush2.bf16.msra.mxu1 %v5501_v22  ;;  %3750 = vmatprep.subr.bf16.mxu0 %v5506_v24  ;;  %v5567_v22 = vld [vmem:[%s7566_s1 + $0xc24] ss:$8 sps:$4 sm:$0xff]  }
 0x16d   :  { %3791 = vmatprep.subr.bf16.mxu1 %v5509_v25  ;;  %v5570_v24 = vld [vmem:[%s7566_s1 + $0xd24] ss:$8 sps:$4 sm:$0xff]   ;;  %v5565_v25 = vld [vmem:[%s7566_s1 + $0xc20] ss:$8 sps:$4 sm:$0xff]  }
 0x16f   :  { %3751 = vmatpush2.bf16.msra.mxu0 %v5504_v26  ;;  %v5568_v26 = vld [vmem:[%s7566_s1 + $0xd20] ss:$8 sps:$4 sm:$0xff]  }
 0x170   :  { %3792 = vmatpush2.bf16.msra.mxu1 %v5507_v27  ;;  %3752 = vmatprep.subr.bf16.mxu0 %v5512_v28  ;;  %v5573_v27 = vld [vmem:[%s7566_s1 + $0xc14] ss:$8 sps:$4 sm:$0xff]  }
 0x171   :  { %3793 = vmatprep.subr.bf16.mxu1 %v5515_v29  ;;  %v5576_v28 = vld [vmem:[%s7566_s1 + $0xd14] ss:$8 sps:$4 sm:$0xff]   ;;  %v5571_v29 = vld [vmem:[%s7566_s1 + $0xc10] ss:$8 sps:$4 sm:$0xff]  }
 0x173   :  { %3753 = vmatpush2.bf16.msra.mxu0 %v5510_v30  ;;  %v5574_v30 = vld [vmem:[%s7566_s1 + $0xd10] ss:$8 sps:$4 sm:$0xff]  }
 0x174   :  { %3794 = vmatpush2.bf16.msra.mxu1 %v5513_v31  ;;  %3754 = vmatprep.subr.bf16.mxu0 %v5518_v32  ;;  %v5579_v31 = vld [vmem:[%s7566_s1 + $0xc04] ss:$8 sps:$4 sm:$0xff]  }
 0x175   :  { %3795 = vmatprep.subr.bf16.mxu1 %v5521_v33  ;;  %v5582_v32 = vld [vmem:[%s7566_s1 + $0xd04] ss:$8 sps:$4 sm:$0xff]   ;;  %v5577_v33 = vld [vmem:[%s7566_s1 + $0xc00] ss:$8 sps:$4 sm:$0xff]  }
 0x177   :  { %3755 = vmatpush2.bf16.msra.mxu0 %v5516_v36  ;;  %v5585_v36 = vld [vmem:[%s7566_s1 + $0xcf4] ss:$8 sps:$4 sm:$0xff]  }
 0x178   :  { %3796 = vmatpush2.bf16.msra.mxu1 %v5519_v37  ;;  %3756 = vmatprep.subr.bf16.mxu0 %v5524_v39  ;;  %v5588_v37 = vld [vmem:[%s7566_s1 + $0xdf4] ss:$8 sps:$4 sm:$0xff]   ;;  %v5583_v39 = vld [vmem:[%s7566_s1 + $0xcf0] ss:$8 sps:$4 sm:$0xff]  }
 0x179   :  { %3797 = vmatprep.subr.bf16.mxu1 %v5527_v55  ;;  %v5586_v55 = vld [vmem:[%s7566_s1 + $0xdf0] ss:$8 sps:$4 sm:$0xff]  }
 0x17b   :  { %3757 = vmatpush2.bf16.msra.mxu0 %v5522_v42  ;;  %v5594_v42 = vld [vmem:[%s7566_s1 + $0xde4] ss:$8 sps:$4 sm:$0xff]  }
 0x17c   :  { %3798 = vmatpush2.bf16.msra.mxu1 %v5525_v44  ;;  %3758 = vmatprep.subr.bf16.mxu0 %v5530_v45  ;;  %v5589_v44 = vld [vmem:[%s7566_s1 + $0xce0] ss:$8 sps:$4 sm:$0xff]  }
 0x17d   :  { %3799 = vmatprep.subr.bf16.mxu1 %v5533_v17  ;;  %v5592_v45 = vld [vmem:[%s7566_s1 + $0xde0] ss:$8 sps:$4 sm:$0xff]   ;;  %v5597_v17 = vld [vmem:[%s7566_s1 + $0xcd4] ss:$8 sps:$4 sm:$0xff]  }
 0x17f   :  { %3759 = vmatpush2.bf16.msra.mxu0 %v5528_v50  ;;  %v5600_v50 = vld [vmem:[%s7566_s1 + $0xdd4] ss:$8 sps:$4 sm:$0xff]  }
 0x180   :  { %3800 = vmatpush2.bf16.msra.mxu1 %v5531_v52  ;;  %3810 = vmatprep.subr.bf16.mxu0 %v5537_v53  ;;  %v5595_v52 = vld [vmem:[%s7566_s1 + $0xcd0] ss:$8 sps:$4 sm:$0xff]  }
 0x181   :  { %3851 = vmatprep.subr.bf16.mxu1 %v5540_v54  ;;  %v5598_v53 = vld [vmem:[%s7566_s1 + $0xdd0] ss:$8 sps:$4 sm:$0xff]   ;;  %v5603_v54 = vld [vmem:[%s7566_s1 + $0xcc4] ss:$8 sps:$4 sm:$0xff]  }
 0x182   :  { %v3516_v62 = vpop.f32.mrf.mxu0  ;;  %3761 = vmatmul.mubr.bf16.vlgmr.msra.gmra.mxu0 %v222_v56  ;;  %v5604_v56 = vld [vmem:[%s7566_s1 + $0xdc0] ss:$8 sps:$4 sm:$0xff]  }
 0x183   :  { %v3557_v63 = vpop.f32.mrf.mxu1  ;;  %3802 = vmatmul.mubr.bf16.vlgmr.msra.gmra.mxu1 %v224_v57  ;;  %v3517_v0 = vadd.f32 %v3516_v62, %v6895_v46  ;;  %3811 = vmatpush1.bf16.msra.mxu0 %v5535_v58  ;;  %v5552_v46 = vld [vmem:[%s7566_s1 + $0xd54] ss:$8 sps:$4 sm:$0xff]   ;;  %v5613_v62 = vld [vmem:[%s7566_s1 + $0xca0] ss:$8 sps:$4 sm:$0xff]  }
 0x184   :  { %3852 = vmatpush1.bf16.msra.mxu1 %v5538_v59  ;;  %v3518_v3 = vpop.f32.mrf.mxu0  ;;  %3812 = vmatprep.subr.bf16.mxu0 %v5543_v60  ;;  %v5609_v57 = vld [vmem:[%s7566_s1 + $0xcb4] ss:$8 sps:$4 sm:$0xff]   ;;  %v5607_v59 = vld [vmem:[%s7566_s1 + $0xcb0] ss:$8 sps:$4 sm:$0xff]  }
 0x185   :  { %v3559_v4 = vpop.f32.mrf.mxu1  ;;  %3853 = vmatprep.subr.bf16.mxu1 %v5546_v18  ;;  %v7110_v40 = vadd.f32 %v3557_v63, %v3517_v0  ;;  %v3519_v41 = vadd.f32 %v3518_v3, %v6898_v51  ;;  %3842 = vmatprep.mubr.bf16.mxu0 %v227_v19  ;;  %v5555_v51 = vld [vmem:[%s7566_s1 + $0xc44] ss:$8 sps:$4 sm:$0xff]   ;;  %v5612_v58 = vld [vmem:[%s7566_s1 + $0xdb4] ss:$8 sps:$4 sm:$0xff]   ;;  %v5610_v60 = vld [vmem:[%s7566_s1 + $0xdb0] ss:$8 sps:$4 sm:$0xff]  }
 0x186   :  { %3883 = vmatprep.mubr.bf16.mxu1 %v229_v61  ;;  %v3520_v5 = vpop.f32.mrf.mxu0  ;;  %v5615_v18 = vld [vmem:[%s7566_s1 + $0xca4] ss:$8 sps:$4 sm:$0xff]   ;;  %v25_v61 = vld [vmem:[%s7565_s0 + $0x38] sm:$0xff]  ;;  %v5616_v63 = vld [vmem:[%s7566_s1 + $0xda0] ss:$8 sps:$4 sm:$0xff]  }
 0x187   :  { %v3561_v6 = vpop.f32.mrf.mxu1  ;;  %v7113_v7 = vadd.f32 %v3559_v4, %v3519_v41  ;;  %3813 = vmatpush1.bf16.msra.mxu0 %v5541_v1  ;;  %v5618_v19 = vld [vmem:[%s7566_s1 + $0xda4] ss:$8 sps:$4 sm:$0xff]   ;;  %v5621_v0 = vld [vmem:[%s7566_s1 + $0xc94] ss:$8 sps:$4 sm:$0xff]   ;;  %v5619_v3 = vld [vmem:[%s7566_s1 + $0xc90] ss:$8 sps:$4 sm:$0xff]   ;;  %v7275_v41 = vrot.slane %v25_v61, %v5939_v49 }
 0x188   :  { %3854 = vmatpush1.bf16.msra.mxu1 %v5544_v2  ;;  %v3521_v10 = vpop.f32.mrf.mxu0  ;;  %3814 = vmatprep.subr.bf16.mxu0 %v5549_v43  ;;  %v5624_v1 = vld [vmem:[%s7566_s1 + $0xd94] ss:$8 sps:$4 sm:$0xff]   ;;  %v153_v2 = vcombine.high %v25_v61, %v25_v61  ;;  %v5622_v4 = vld [vmem:[%s7566_s1 + $0xd90] ss:$8 sps:$4 sm:$0xff]   ;;  %v5627_v43 = vld [vmem:[%s7566_s1 + $0xc84] ss:$8 sps:$4 sm:$0xff]  }
 0x189   :  { %v3562_v11 = vpop.f32.mrf.mxu1  ;;  %3855 = vmatprep.subr.bf16.mxu1 %v5552_v46  ;;  %v5630_v46 = vld [vmem:[%s7566_s1 + $0xd84] ss:$8 sps:$4 sm:$0xff]   ;;  %v5625_v6 = vld [vmem:[%s7566_s1 + $0xc80] ss:$8 sps:$4 sm:$0xff]   ;;  %v168_v10 = vcombine.high %v7275_v41, %v7275_v41  ;;  %v5682_v61 = vld [vmem:[%s7566_s1 + $0xef4] ss:$8 sps:$4 sm:$0xff]  }
 0x18a   :  { %v7278_v5 = vrot.slane %v153_v2, %v5939_v49  ;;  %v5637_v49 = vld [vmem:[%s7566_s1 + $0xf74] ss:$8 sps:$4 sm:$0xff]   ;;  %v5691_v2 = vld [vmem:[%s7566_s1 + $0xfe4] ss:$8 sps:$4 sm:$0xff]  }
 0x18b   :  { %3815 = vmatpush1.bf16.msra.mxu0 %v5547_v8  ;;  %v5628_v8 = vld [vmem:[%s7566_s1 + $0xd80] ss:$8 sps:$4 sm:$0xff]  }
 0x18c   :  { %3856 = vmatpush1.bf16.msra.mxu1 %v5550_v9  ;;  %3816 = vmatprep.subr.bf16.mxu0 %v5555_v51  ;;  %v5634_v9 = vld [vmem:[%s7566_s1 + $0xe74] ss:$8 sps:$4 sm:$0xff]   ;;  %v169_v11 = vcombine.high %v7278_v5, %v7278_v5  ;;  %v226_v51 = vpack.c.bf16 %v7060_v47, %v7060_v47  ;;  %v5643_v47 = vld [vmem:[%s7566_s1 + $0xf64] ss:$8 sps:$4 sm:$0xff]  }
 0x18d   :  { %3857 = vmatprep.subr.bf16.mxu1 %v5558_v12  ;;  %v228_v12 = vpack.c.bf16 %v7063_v48, %v7063_v48  ;;  %v231_v48 = vpack.c.bf16 %v168_v10, %v168_v10  ;;  %v5698_v10 = vld [vmem:[%s7566_s1 + $0xec0] ss:$8 sps:$4 sm:$0xff]  }
 0x18f   :  { %3817 = vmatpush1.bf16.msra.mxu0 %v5553_v13  ;;  %v5632_v13 = vld [vmem:[%s7566_s1 + $0xe70] ss:$8 sps:$4 sm:$0xff]  }
 0x190   :  { %3858 = vmatpush1.bf16.msra.mxu1 %v5556_v14  ;;  %3818 = vmatprep.subr.bf16.mxu0 %v5561_v15  ;;  %v5635_v14 = vld [vmem:[%s7566_s1 + $0xf70] ss:$8 sps:$4 sm:$0xff]   ;;  %v5640_v15 = vld [vmem:[%s7566_s1 + $0xe64] ss:$8 sps:$4 sm:$0xff]  }
 0x191   :  { %3859 = vmatprep.subr.bf16.mxu1 %v5564_v16  ;;  %v233_v16 = vpack.c.bf16 %v169_v11, %v169_v11  ;;  %v5701_v11 = vld [vmem:[%s7566_s1 + $0xfc0] ss:$8 sps:$4 sm:$0xff]  }
 0x193   :  { %3819 = vmatpush1.bf16.msra.mxu0 %v5559_v20 }
 0x194   :  { %3860 = vmatpush1.bf16.msra.mxu1 %v5562_v21  ;;  %3820 = vmatprep.subr.bf16.mxu0 %v5567_v22 }
 0x195   :  { %3861 = vmatprep.subr.bf16.mxu1 %v5570_v24  ;;  %v5638_v24 = vld [vmem:[%s7566_s1 + $0xe60] ss:$8 sps:$4 sm:$0xff]  }
 0x197   :  { %3821 = vmatpush1.bf16.msra.mxu0 %v5565_v25  ;;  %v5641_v25 = vld [vmem:[%s7566_s1 + $0xf60] ss:$8 sps:$4 sm:$0xff]  }
 0x198   :  { %3862 = vmatpush1.bf16.msra.mxu1 %v5568_v26  ;;  %3822 = vmatprep.subr.bf16.mxu0 %v5573_v27 }
 0x199   :  { %3863 = vmatprep.subr.bf16.mxu1 %v5576_v28  ;;  %v5646_v28 = vld [vmem:[%s7566_s1 + $0xe54] ss:$8 sps:$4 sm:$0xff]  }
 0x19b   :  { %3823 = vmatpush1.bf16.msra.mxu0 %v5571_v29 }
 0x19c   :  { %3864 = vmatpush1.bf16.msra.mxu1 %v5574_v30  ;;  %3824 = vmatprep.subr.bf16.mxu0 %v5579_v31 }
 0x19d   :  { %3865 = vmatprep.subr.bf16.mxu1 %v5582_v32 }
 0x19f   :  { %3825 = vmatpush1.bf16.msra.mxu0 %v5577_v33 }
 0x1a0   :  { %3866 = vmatpush1.bf16.msra.mxu1 %v5580_v34  ;;  %3826 = vmatprep.subr.bf16.mxu0 %v5585_v36  ;;  %v5644_v34 = vld [vmem:[%s7566_s1 + $0xe50] ss:$8 sps:$4 sm:$0xff]  }
 0x1a1   :  { %3867 = vmatprep.subr.bf16.mxu1 %v5588_v37  ;;  %v5647_v36 = vld [vmem:[%s7566_s1 + $0xf50] ss:$8 sps:$4 sm:$0xff]  }
 0x1a3   :  { %3827 = vmatpush2.bf16.msra.mxu0 %v5583_v39 }
 0x1a4   :  { %3868 = vmatpush2.bf16.msra.mxu1 %v5586_v55  ;;  %3828 = vmatprep.subr.bf16.mxu0 %v5591_v38  ;;  %v5655_v55 = vld [vmem:[%s7566_s1 + $0xf44] ss:$8 sps:$4 sm:$0xff]   ;;  %v5650_v38 = vld [vmem:[%s7566_s1 + $0xe40] ss:$8 sps:$4 sm:$0xff]  }
 0x1a5   :  { %3869 = vmatprep.subr.bf16.mxu1 %v5594_v42  ;;  %v5653_v42 = vld [vmem:[%s7566_s1 + $0xf40] ss:$8 sps:$4 sm:$0xff]  }
 0x1a7   :  { %3829 = vmatpush2.bf16.msra.mxu0 %v5589_v44  ;;  %v5658_v44 = vld [vmem:[%s7566_s1 + $0xe34] ss:$8 sps:$4 sm:$0xff]  }
 0x1a8   :  { %3870 = vmatpush2.bf16.msra.mxu1 %v5592_v45  ;;  %3830 = vmatprep.subr.bf16.mxu0 %v5597_v17  ;;  %v5661_v45 = vld [vmem:[%s7566_s1 + $0xf34] ss:$8 sps:$4 sm:$0xff]   ;;  %v5656_v17 = vld [vmem:[%s7566_s1 + $0xe30] ss:$8 sps:$4 sm:$0xff]  }
 0x1a9   :  { %3871 = vmatprep.subr.bf16.mxu1 %v5600_v50  ;;  %v5659_v50 = vld [vmem:[%s7566_s1 + $0xf30] ss:$8 sps:$4 sm:$0xff]  }
 0x1ab   :  { %3831 = vmatpush2.bf16.msra.mxu0 %v5595_v52  ;;  %v5664_v52 = vld [vmem:[%s7566_s1 + $0xe24] ss:$8 sps:$4 sm:$0xff]  }
 0x1ac   :  { %3872 = vmatpush2.bf16.msra.mxu1 %v5598_v53  ;;  %3832 = vmatprep.subr.bf16.mxu0 %v5603_v54  ;;  %v5667_v53 = vld [vmem:[%s7566_s1 + $0xf24] ss:$8 sps:$4 sm:$0xff]   ;;  %v5662_v54 = vld [vmem:[%s7566_s1 + $0xe20] ss:$8 sps:$4 sm:$0xff]  }
 0x1ad   :  { %3873 = vmatprep.subr.bf16.mxu1 %v5606_v35  ;;  %v5665_v35 = vld [vmem:[%s7566_s1 + $0xf20] ss:$8 sps:$4 sm:$0xff]  }
 0x1af   :  { %3833 = vmatpush2.bf16.msra.mxu0 %v5601_v23  ;;  %v5670_v23 = vld [vmem:[%s7566_s1 + $0xe14] ss:$8 sps:$4 sm:$0xff]  }
 0x1b0   :  { %3874 = vmatpush2.bf16.msra.mxu1 %v5604_v56  ;;  %3834 = vmatprep.subr.bf16.mxu0 %v5609_v57  ;;  %v5673_v56 = vld [vmem:[%s7566_s1 + $0xf14] ss:$8 sps:$4 sm:$0xff]   ;;  %v5668_v57 = vld [vmem:[%s7566_s1 + $0xe10] ss:$8 sps:$4 sm:$0xff]  }
 0x1b1   :  { %3875 = vmatprep.subr.bf16.mxu1 %v5612_v58  ;;  %v5671_v58 = vld [vmem:[%s7566_s1 + $0xf10] ss:$8 sps:$4 sm:$0xff]  }
 0x1b3   :  { %3835 = vmatpush2.bf16.msra.mxu0 %v5607_v59  ;;  %v5676_v59 = vld [vmem:[%s7566_s1 + $0xe04] ss:$8 sps:$4 sm:$0xff]  }
 0x1b4   :  { %3876 = vmatpush2.bf16.msra.mxu1 %v5610_v60  ;;  %3836 = vmatprep.subr.bf16.mxu0 %v5615_v18  ;;  %v5679_v60 = vld [vmem:[%s7566_s1 + $0xf04] ss:$8 sps:$4 sm:$0xff]   ;;  %v5674_v18 = vld [vmem:[%s7566_s1 + $0xe00] ss:$8 sps:$4 sm:$0xff]  }
 0x1b5   :  { %3877 = vmatprep.subr.bf16.mxu1 %v5618_v19  ;;  %v5677_v19 = vld [vmem:[%s7566_s1 + $0xf00] ss:$8 sps:$4 sm:$0xff]  }
 0x1b7   :  { %3837 = vmatpush2.bf16.msra.mxu0 %v5613_v62  ;;  %v5685_v62 = vld [vmem:[%s7566_s1 + $0xff4] ss:$8 sps:$4 sm:$0xff]  }
 0x1b8   :  { %3878 = vmatpush2.bf16.msra.mxu1 %v5616_v63  ;;  %3838 = vmatprep.subr.bf16.mxu0 %v5621_v0  ;;  %v5680_v63 = vld [vmem:[%s7566_s1 + $0xef0] ss:$8 sps:$4 sm:$0xff]  }
 0x1b9   :  { %3879 = vmatprep.subr.bf16.mxu1 %v5624_v1  ;;  %v5683_v0 = vld [vmem:[%s7566_s1 + $0xff0] ss:$8 sps:$4 sm:$0xff]   ;;  %v5688_v1 = vld [vmem:[%s7566_s1 + $0xee4] ss:$8 sps:$4 sm:$0xff]  }
 0x1bb   :  { %3839 = vmatpush2.bf16.msra.mxu0 %v5619_v3  ;;  %v5686_v3 = vld [vmem:[%s7566_s1 + $0xee0] ss:$8 sps:$4 sm:$0xff]  }
 0x1bc   :  { %3880 = vmatpush2.bf16.msra.mxu1 %v5622_v4  ;;  %3840 = vmatprep.subr.bf16.mxu0 %v5627_v43  ;;  %v5689_v4 = vld [vmem:[%s7566_s1 + $0xfe0] ss:$8 sps:$4 sm:$0xff]   ;;  %v5694_v43 = vld [vmem:[%s7566_s1 + $0xed4] ss:$8 sps:$4 sm:$0xff]  }
 0x1bd   :  { %3881 = vmatprep.subr.bf16.mxu1 %v5630_v46  ;;  %v5697_v46 = vld [vmem:[%s7566_s1 + $0xfd4] ss:$8 sps:$4 sm:$0xff]  }
 0x1bf   :  { %3841 = vmatpush2.bf16.msra.mxu0 %v5625_v6  ;;  %v5692_v6 = vld [vmem:[%s7566_s1 + $0xed0] ss:$8 sps:$4 sm:$0xff]  }
 0x1c0   :  { %3882 = vmatpush2.bf16.msra.mxu1 %v5628_v8  ;;  %3892 = vmatprep.subr.bf16.mxu0 %v5634_v9  ;;  %v5695_v8 = vld [vmem:[%s7566_s1 + $0xfd0] ss:$8 sps:$4 sm:$0xff]   ;;  %v5700_v9 = vld [vmem:[%s7566_s1 + $0xec4] ss:$8 sps:$4 sm:$0xff]  }
 0x1c1   :  { %3933 = vmatprep.subr.bf16.mxu1 %v5637_v49  ;;  %v5703_v49 = vld [vmem:[%s7566_s1 + $0xfc4] ss:$8 sps:$4 sm:$0xff]  }
 0x1c2   :  { %v3598_v20 = vpop.f32.mrf.mxu0  ;;  %3843 = vmatmul.mubr.bf16.vlgmr.msra.gmra.mxu0 %v226_v51  ;;  %v5706_v51 = vld [vmem:[%s7566_s1 + $0xeb4] ss:$8 sps:$4 sm:$0xff]  }
 0x1c3   :  { %v3639_v21 = vpop.f32.mrf.mxu1  ;;  %3884 = vmatmul.mubr.bf16.vlgmr.msra.gmra.mxu1 %v228_v12  ;;  %v3599_v22 = vadd.f32 %v3598_v20, %v7110_v40  ;;  %3893 = vmatpush1.bf16.msra.mxu0 %v5632_v13  ;;  %v5649_v40 = vld [vmem:[%s7566_s1 + $0xf54] ss:$8 sps:$4 sm:$0xff]   ;;  %v5704_v13 = vld [vmem:[%s7566_s1 + $0xeb0] ss:$8 sps:$4 sm:$0xff]  }
 0x1c4   :  { %3934 = vmatpush1.bf16.msra.mxu1 %v5635_v14  ;;  %v3600_v26 = vpop.f32.mrf.mxu0  ;;  %3894 = vmatprep.subr.bf16.mxu0 %v5640_v15  ;;  %v5709_v12 = vld [vmem:[%s7566_s1 + $0xfb4] ss:$8 sps:$4 sm:$0xff]   ;;  %v5707_v14 = vld [vmem:[%s7566_s1 + $0xfb0] ss:$8 sps:$4 sm:$0xff]   ;;  %v5712_v15 = vld [vmem:[%s7566_s1 + $0xea4] ss:$8 sps:$4 sm:$0xff]  }
 0x1c5   :  { %v3641_v27 = vpop.f32.mrf.mxu1  ;;  %3935 = vmatprep.subr.bf16.mxu1 %v5643_v47  ;;  %v7325_v29 = vadd.f32 %v3639_v21, %v3599_v22  ;;  %v3601_v30 = vadd.f32 %v3600_v26, %v7113_v7  ;;  %3924 = vmatprep.mubr.bf16.mxu0 %v231_v48  ;;  %v5652_v7 = vld [vmem:[%s7566_s1 + $0xe44] ss:$8 sps:$4 sm:$0xff]   ;;  %v5710_v48 = vld [vmem:[%s7566_s1 + $0xea0] ss:$8 sps:$4 sm:$0xff]   ;;  %v5718_v20 = vld [vmem:[%s7566_s1 + $0xe94] ss:$8 sps:$4 sm:$0xff]  }
 0x1c6   :  { %3965 = vmatprep.mubr.bf16.mxu1 %v233_v16  ;;  %v3602_v31 = vpop.f32.mrf.mxu0  ;;  %v5715_v47 = vld [vmem:[%s7566_s1 + $0xfa4] ss:$8 sps:$4 sm:$0xff]   ;;  %v5713_v16 = vld [vmem:[%s7566_s1 + $0xfa0] ss:$8 sps:$4 sm:$0xff]   ;;  %v5721_v21 = vld [vmem:[%s7566_s1 + $0xf94] ss:$8 sps:$4 sm:$0xff]  }
 0x1c7   :  { %v3643_v32 = vpop.f32.mrf.mxu1  ;;  %v7328_v33 = vadd.f32 %v3641_v27, %v3601_v30  ;;  %3895 = vmatpush1.bf16.msra.mxu0 %v5638_v24  ;;  %v5716_v22 = vld [vmem:[%s7566_s1 + $0xe90] ss:$8 sps:$4 sm:$0xff]   ;;  %v5727_v26 = vld [vmem:[%s7566_s1 + $0xf84] ss:$8 sps:$4 sm:$0xff]   ;;  %v5722_v27 = vld [vmem:[%s7566_s1 + $0xe80] ss:$8 sps:$4 sm:$0xff]   ;;  %v232_v30 = vpack.c.bf16 %v7278_v5, %v7278_v5 }
 0x1c8   :  { %3936 = vmatpush1.bf16.msra.mxu1 %v5641_v25  ;;  %v3603_v37 = vpop.f32.mrf.mxu0  ;;  %3896 = vmatprep.subr.bf16.mxu0 %v5646_v28  ;;  %v5719_v24 = vld [vmem:[%s7566_s1 + $0xf90] ss:$8 sps:$4 sm:$0xff]   ;;  %v5724_v25 = vld [vmem:[%s7566_s1 + $0xe84] ss:$8 sps:$4 sm:$0xff]   ;;  %v5725_v28 = vld [vmem:[%s7566_s1 + $0xf80] ss:$8 sps:$4 sm:$0xff]  }
 0x1c9   :  { %v3644_v39 = vpop.f32.mrf.mxu1  ;;  %3937 = vmatprep.subr.bf16.mxu1 %v5649_v40  ;;  %v230_v40 = vpack.c.bf16 %v7275_v41, %v7275_v41  ;;  %v7501_v5 = vld [vmem:[%s7568_s3 + $0x18] sm:$0xff] }
 0x1cb   :  { %3897 = vmatpush1.bf16.msra.mxu0 %v5644_v34 }
 0x1cc   :  { %3938 = vmatpush1.bf16.msra.mxu1 %v5647_v36  ;;  %3898 = vmatprep.subr.bf16.mxu0 %v5652_v7 }
 0x1cd   :  { %3939 = vmatprep.subr.bf16.mxu1 %v5655_v55 }
 0x1cf   :  { %3899 = vmatpush1.bf16.msra.mxu0 %v5650_v38 }
 0x1d0   :  { %3940 = vmatpush1.bf16.msra.mxu1 %v5653_v42  ;;  %3900 = vmatprep.subr.bf16.mxu0 %v5658_v44 }
 0x1d1   :  { %3941 = vmatprep.subr.bf16.mxu1 %v5661_v45  ;;  %v5764_v45 = vmov 0.0  }
 0x1d3   :  { %3901 = vmatpush1.bf16.msra.mxu0 %v5656_v17 }
 0x1d4   :  { %3942 = vmatpush1.bf16.msra.mxu1 %v5659_v50  ;;  %3902 = vmatprep.subr.bf16.mxu0 %v5664_v52  ;;  %v7520_v52 = vld [vmem:[%s7568_s3 + $0x8] sm:$0xff] }
 0x1d5   :  { %3943 = vmatprep.subr.bf16.mxu1 %v5667_v53 }
 0x1d7   :  { %3903 = vmatpush1.bf16.msra.mxu0 %v5662_v54 }
 0x1d8   :  { %3944 = vmatpush1.bf16.msra.mxu1 %v5665_v35  ;;  %3904 = vmatprep.subr.bf16.mxu0 %v5670_v23 }
 0x1d9   :  { %3945 = vmatprep.subr.bf16.mxu1 %v5673_v56  ;;  %v7529_v56 = vld [vmem:[%s7568_s3] sm:$0xff] }
 0x1db   :  { %3905 = vmatpush1.bf16.msra.mxu0 %v5668_v57 }
 0x1dc   :  { %3946 = vmatpush1.bf16.msra.mxu1 %v5671_v58  ;;  %3906 = vmatprep.subr.bf16.mxu0 %v5676_v59 }
 0x1dd   :  { %3947 = vmatprep.subr.bf16.mxu1 %v5679_v60 }
 0x1df   :  { %3907 = vmatpush1.bf16.msra.mxu0 %v5674_v18 }
 0x1e0   :  { %3948 = vmatpush1.bf16.msra.mxu1 %v5677_v19  ;;  %3908 = vmatprep.subr.bf16.mxu0 %v5682_v61  ;;  %v5766_v19 = vmov 0   ;;  %v5767_v61 = vmov 1  }
 0x1e1   :  { %3949 = vmatprep.subr.bf16.mxu1 %v5685_v62  ;;  %4943 = vset.pattern.permute.xlu1 %v5766_v19 }
 0x1e2   :  { %4944 = vset.pattern.permute.xlu0 %v5767_v61 }
 0x1e3   :  { %3909 = vmatpush2.bf16.msra.mxu0 %v5680_v63 }
 0x1e4   :  { %3950 = vmatpush2.bf16.msra.mxu1 %v5683_v0  ;;  %3910 = vmatprep.subr.bf16.mxu0 %v5688_v1 }
 0x1e5   :  { %3951 = vmatprep.subr.bf16.mxu1 %v5691_v2 }
 0x1e7   :  { %3911 = vmatpush2.bf16.msra.mxu0 %v5686_v3 }
 0x1e8   :  { %3952 = vmatpush2.bf16.msra.mxu1 %v5689_v4  ;;  %3912 = vmatprep.subr.bf16.mxu0 %v5694_v43 }
 0x1e9   :  { %3953 = vmatprep.subr.bf16.mxu1 %v5697_v46 }
 0x1eb   :  { %3913 = vmatpush2.bf16.msra.mxu0 %v5692_v6 }
 0x1ec   :  { %3954 = vmatpush2.bf16.msra.mxu1 %v5695_v8  ;;  %3914 = vmatprep.subr.bf16.mxu0 %v5700_v9 }
 0x1ed   :  { %3955 = vmatprep.subr.bf16.mxu1 %v5703_v49 }
 0x1ef   :  { %3915 = vmatpush2.bf16.msra.mxu0 %v5698_v10 }
 0x1f0   :  { %3956 = vmatpush2.bf16.msra.mxu1 %v5701_v11  ;;  %3916 = vmatprep.subr.bf16.mxu0 %v5706_v51 }
 0x1f1   :  { %3957 = vmatprep.subr.bf16.mxu1 %v5709_v12 }
 0x1f3   :  { %3917 = vmatpush2.bf16.msra.mxu0 %v5704_v13 }
 0x1f4   :  { %3958 = vmatpush2.bf16.msra.mxu1 %v5707_v14  ;;  %3918 = vmatprep.subr.bf16.mxu0 %v5712_v15 }
 0x1f5   :  { %3959 = vmatprep.subr.bf16.mxu1 %v5715_v47 }
 0x1f7   :  { %3919 = vmatpush2.bf16.msra.mxu0 %v5710_v48 }
 0x1f8   :  { %3960 = vmatpush2.bf16.msra.mxu1 %v5713_v16  ;;  %3920 = vmatprep.subr.bf16.mxu0 %v5718_v20 }
 0x1f9   :  { %3961 = vmatprep.subr.bf16.mxu1 %v5721_v21  ;;  %v5771_v21 = vmov 2  }
 0x1fb   :  { %3921 = vmatpush2.bf16.msra.mxu0 %v5716_v22  ;;  %v5772_v22 = vmov 4  }
 0x1fc   :  { %3962 = vmatpush2.bf16.msra.mxu1 %v5719_v24  ;;  %3922 = vmatprep.subr.bf16.mxu0 %v5724_v25  ;;  %v5773_v24 = vmov 3   ;;  %v5774_v25 = vmov 7  }
 0x1fd   :  { %3963 = vmatprep.subr.bf16.mxu1 %v5727_v26  ;;  %v5775_v26 = vmov 5  }
 0x1ff   :  { %3923 = vmatpush2.bf16.msra.mxu0 %v5722_v27  ;;  %v5776_v27 = vmov 8  }
 0x200   :  { %3964 = vmatpush2.bf16.msra.mxu1 %v5725_v28  ;;  %4883 = vmatprep.subr.mxu0 %v5764_v45  ;;  %v5777_v28 = vmov 6  }
 0x201   :  { %4894 = vmatprep.subr.mxu1 %v5764_v45 }
 0x202   :  { %v3680_v31 = vpop.f32.mrf.mxu0  ;;  %3925 = vmatmul.mubr.bf16.vlgmr.msra.gmra.mxu0 %v230_v40 }
 0x203   :  { %v3721_v32 = vpop.f32.mrf.mxu1  ;;  %3966 = vmatmul.mubr.bf16.vlgmr.msra.gmra.mxu1 %v232_v30  ;;  %v3681_v34 = vadd.f32 %v3680_v31, %v7325_v29  ;;  %4884 = vmatpush3.msra.mxu0 %v7501_v5  ;;  %v7512_v29 = vld [vmem:[%s7568_s3 + $0x10] sm:$0xff]  ;;  %s5768_s3 = smov 32  }
 0x204   :  { %v3682_v36 = vpop.f32.mrf.mxu0  ;;  %4895 = vmatpush3.msra.mxu1 %v7501_v5  ;;  %4885 = vmatprep.subr.mxu0 %v5764_v45 }
 0x205   :  { %v3723_v37 = vpop.f32.mrf.mxu1  ;;  %v3722_v39 = vadd.f32 %v3721_v32, %v3681_v34  ;;  %v3683_v7 = vadd.f32 %v3682_v36, %v7328_v33  ;;  %4896 = vmatprep.subr.mxu1 %v5764_v45  ;;  %4886 = vmatpush3.msra.mxu0 %v7512_v29 }
 0x206   :  { %v3684_v55 = vpop.f32.mrf.mxu0  ;;  %4897 = vmatpush3.msra.mxu1 %v7512_v29  ;;  %4887 = vmatprep.subr.mxu0 %v5764_v45 }
 0x207   :  { %v3725_v38 = vpop.f32.mrf.mxu1  ;;  %v3724_v42 = vadd.f32 %v3723_v37, %v3683_v7  ;;  %4898 = vmatprep.subr.mxu1 %v5764_v45  ;;  %4888 = vmatpush3.msra.mxu0 %v7520_v52 }
 0x208   :  { %v3685_v41 = vpop.f32.mrf.mxu0  ;;  %4899 = vmatpush3.msra.mxu1 %v7520_v52  ;;  %4889 = vmatprep.subr.mxu0 %v5764_v45 }
 0x209   :  { %v3726_v44 = vpop.f32.mrf.mxu1  ;;  %4900 = vmatprep.subr.mxu1 %v5764_v45  ;;  %4890 = vmatpush3.msra.mxu0 %v7529_v56 }
 0x20a   :  { %4891 = vmatprep.mubr.msk.f32.mxu0 %vm5765_vm0, %v5764_v45  ;;  %4905 = vmatprep.subr.mxu0 %v5764_v45 }
 0x20b   :  { %4901 = vmatpush3.msra.mxu1 %v7529_v56  ;;  %4902 = vmatprep.mubr.msk.f32.mxu1 %vm5765_vm0, %v5764_v45 }
 0x20c   :  { %4916 = vmatprep.subr.mxu1 %v5764_v45 }
 0x242   :  { %v3762_v33 = vpop.f32.mrf.mxu0 }
 0x243   :  { %v3803_v17 = vpop.f32.mrf.mxu1  ;;  %v3763_v50 = vadd.f32 %v3762_v33, %v3722_v39 }
 0x244   :  { %v3764_v53 = vpop.f32.mrf.mxu0 }
 0x245   :  { %v3805_v54 = vpop.f32.mrf.mxu1  ;;  %v3804_v35 = vadd.f32 %v3803_v17, %v3763_v50  ;;  %v3765_v23 = vadd.f32 %v3764_v53, %v3724_v42 }
 0x246   :  { %v3766_v57 = vpop.f32.mrf.mxu0 }
 0x247   :  { %v3807_v58 = vpop.f32.mrf.mxu1  ;;  %v3806_v59 = vadd.f32 %v3805_v54, %v3765_v23 }
 0x248   :  { %v3767_v60 = vpop.f32.mrf.mxu0 }
 0x249   :  { %v3808_v18 = vpop.f32.mrf.mxu1 }
 0x282   :  { %v3844_v62 = vpop.f32.mrf.mxu0 }
 0x283   :  { %v3885_v63 = vpop.f32.mrf.mxu1  ;;  %v3845_v8 = vadd.f32 %v3844_v62, %v3804_v35 }
 0x284   :  { %v3846_v0 = vpop.f32.mrf.mxu0 }
 0x285   :  { %v3887_v1 = vpop.f32.mrf.mxu1  ;;  %v3847_v2 = vadd.f32 %v3846_v0, %v3806_v59  ;;  %v3886_v9 = vadd.f32 %v3885_v63, %v3845_v8 }
 0x286   :  { %v3848_v3 = vpop.f32.mrf.mxu0 }
 0x287   :  { %v3889_v4 = vpop.f32.mrf.mxu1  ;;  %v3888_v43 = vadd.f32 %v3887_v1, %v3847_v2 }
 0x288   :  { %v3849_v46 = vpop.f32.mrf.mxu0 }
 0x289   :  { %v3890_v6 = vpop.f32.mrf.mxu1 }
 0x2c2   :  { %v3926_v49 = vpop.f32.mrf.mxu0 }
 0x2c3   :  { %v3967_v10 = vpop.f32.mrf.mxu1  ;;  %v3927_v11 = vadd.f32 %v3926_v49, %v3886_v9 }
 0x2c4   :  { %v3928_v51 = vpop.f32.mrf.mxu0 }
 0x2c5   :  { %v3969_v12 = vpop.f32.mrf.mxu1  ;;  %v3968_v13 = vadd.f32 %v3967_v10, %v3927_v11  ;;  %v3929_v14 = vadd.f32 %v3928_v51, %v3888_v43 }
 0x2c6   :  { %v3930_v15 = vpop.f32.mrf.mxu0 }
 0x2c7   :  { %v3971_v47 = vpop.f32.mrf.mxu1  ;;  %4238 = vrot.lane.b32.xlu1 %v3968_v13, %s5768_s3  ;;  %4068 = vrot.lane.b32.xlu0 %v3968_v13, %s5769_s24  ;;  %v3970_v20 = vadd.f32 %v3969_v12, %v3929_v14 }
 0x2c8   :  { %4892 = vmatmul.mubr.msk.f32.vlgmr.msra.gmra.mxu0 %vm3983_vm1, %v3968_v13  ;;  %v3931_v48 = vpop.f32.mrf.mxu0 }
 0x2c9   :  { %v3972_v16 = vpop.f32.mrf.mxu1  ;;  %4906 = vmatpush3.msra.mxu0 %v7501_v5  ;;  %4913 = vmatprep.mubr.msk.f32.mxu0 %vm5765_vm0, %v5764_v45 }
 0x2ca   :  { %4907 = vmatprep.subr.mxu0 %v5764_v45 }
 0x2cb   :  { %3980 = vperm.xlu1 %4943, %v3970_v20   ;;  %4153 = vrot.lane.b32.xlu0 %v3968_v13, %s5770_s25 }
 0x2cc   :  { %4908 = vmatpush3.msra.mxu0 %v7512_v29 }
 0x2cd   :  { %4909 = vmatprep.subr.mxu0 %v5764_v45 }
 0x2ce   :  { %4910 = vmatpush3.msra.mxu0 %v7520_v52 }
 0x2cf   :  { %4945 = vset.pattern.permute.xlu1 %v5771_v21  ;;  %4065 = vperm.xlu0 %4944, %v3970_v20  }
 0x2d0   :  { %4150 = vperm.xlu1 %4945, %v3970_v20   ;;  %4911 = vmatprep.subr.mxu0 %v5764_v45 }
 0x2d1   :  { %4912 = vmatpush3.msra.mxu0 %v7529_v56 }
 0x2d3   :  { %4947 = vset.pattern.permute.xlu0 %v5772_v22 }
 0x2d4   :  { %4946 = vset.pattern.permute.xlu1 %v5773_v24  ;;  %4059 = vperm.xlu0 %4947, %v3970_v20  }
 0x2d5   :  { %4235 = vperm.xlu1 %4946, %v3970_v20  }
 0x2d8   :  { %4950 = vset.pattern.permute.xlu0 %v5774_v25 }
 0x2d9   :  { %4948 = vset.pattern.permute.xlu1 %v5775_v26  ;;  %4314 = vperm.xlu0 %4950, %v3970_v20  }
 0x2da   :  { %4144 = vperm.xlu1 %4948, %v3970_v20  }
 0x2dd   :  { %4952 = vset.pattern.permute.xlu0 %v5776_v27 }
 0x2de   :  { %4949 = vset.pattern.permute.xlu1 %v5777_v28 }
 0x2df   :  { %4229 = vperm.xlu1 %4949, %v3970_v20  }
 0x2e3   :  { %4951 = vset.pattern.permute.xlu1 %v5776_v27 }
 0x2e4   :  { %4320 = vperm.xlu1 %4951, %v3970_v20  }
 0x339   :  { %v4069_v40 = vpop.permute.xlu0 %4068  ;;  %v4239_v31 = vpop.permute.xlu1 %4238 }
 0x33a   :  { %4903 = vmatmul.mubr.msk.f32.vlgmr.msra.gmra.mxu1 %vm3983_vm1, %v4069_v40 }
 0x33b   :  { %4917 = vmatpush3.msra.mxu1 %v7501_v5  ;;  %4924 = vmatprep.mubr.msk.f32.mxu1 %vm5765_vm0, %v5764_v45 }
 0x33c   :  { %4918 = vmatprep.subr.mxu1 %v5764_v45 }
 0x33d   :  { %4919 = vmatpush3.msra.mxu1 %v7512_v29  ;;  %v4154_v30 = vpop.permute.xlu0 %4153 }
 0x33e   :  { %4920 = vmatprep.subr.mxu1 %v5764_v45  ;;  %4914 = vmatmul.mubr.msk.f32.vlgmr.msra.gmra.mxu0 %vm3983_vm1, %v4154_v30 }
 0x33f   :  { %4921 = vmatpush3.msra.mxu1 %v7520_v52 }
 0x340   :  { %4922 = vmatprep.subr.mxu1 %v5764_v45 }
 0x341   :  { %4923 = vmatpush3.msra.mxu1 %v7529_v56 }
 0x342   :  { %4925 = vmatmul.mubr.msk.f32.vlgmr.msra.gmra.mxu1 %vm3983_vm1, %v4239_v31 }
 0x346   :  { %v3981_v36 = vpop.permute.xlu1 %3980 }
 0x34a   :  { %v4066_v39 = vpop.permute.xlu0 %4065 }
 0x34b   :  { %v4151_v38 = vpop.permute.xlu1 %4150 }
 0x34f   :  { %v4060_v35 = vpop.permute.xlu0 %4059 }
 0x350   :  { %v4236_v45 = vpop.permute.xlu1 %4235 }
 0x354   :  { %v4315_v19 = vpop.permute.xlu0 %4314 }
 0x355   :  { %v4145_v50 = vpop.permute.xlu1 %4144 }
 0x35a   :  { %v4230_v57 = vpop.permute.xlu1 %4229 }
 0x35f   :  { %v4321_v63 = vpop.permute.xlu1 %4320 }
 0x388   :  { %v4053_v32 = vpop.f32.mrf.mxu0 }
 0x389   :  { %v4054_v37 = vadd.f32 %v4053_v32, %v3981_v36 }
 0x38a   :  { %v4893_v34 = vpop.f32.mrf.mxu0 }
 0x38b   :  { %5729 = vtanh.f32 %v4054_v37 }
 0x398   :  { %v5730_v52 = vpop.eup %5729 }
 0x399   :  { %v4062_v23 = vmul.f32 %v5730_v52, %v4060_v35 }
 0x3fa   :  { %v4138_v7 = vpop.f32.mrf.mxu1 }
 0x3fb   :  { %v4139_v55 = vadd.f32 %v4138_v7, %v4066_v39 }
 0x3fc   :  { %v4904_v42 = vpop.f32.mrf.mxu1 }
 0x3fd   :  { %5731 = vtanh.f32 %v4139_v55 }
 0x3fe   :  { %v4223_v41 = vpop.f32.mrf.mxu0 }
 0x3ff   :  { %v4224_v44 = vadd.f32 %v4223_v41, %v4151_v38 }
 0x400   :  { %v4915_v5 = vpop.f32.mrf.mxu0 }
 0x401   :  { %5733 = vtanh.f32 %v4224_v44 }
 0x402   :  { %v4308_v29 = vpop.f32.mrf.mxu1 }
 0x403   :  { %v4309_v33 = vadd.f32 %v4308_v29, %v4236_v45 }
 0x404   :  { %v4926_v17 = vpop.f32.mrf.mxu1 }
 0x405   :  { %5735 = vtanh.f32 %v4309_v33 }
 0x40a   :  { %v5732_v53 = vpop.eup %5731 }
 0x40b   :  { %v4147_v54 = vmul.f32 %v5732_v53, %v4145_v50 }
 0x40d   :  { %v4148_v58 = vadd.f32 %v4147_v54, %v4062_v23 }
 0x40e   :  { %v5734_v56 = vpop.eup %5733 }
 0x40f   :  { %v4232_v59 = vmul.f32 %v5734_v56, %v4230_v57 }
 0x411   :  { %v4233_v60 = vadd.f32 %v4232_v59, %v4148_v58 }
 0x412   :  { %v5736_v18 = vpop.eup %5735 }
 0x413   :  { %v4317_v61 = vmul.f32 %v5736_v18, %v4315_v19 }
 0x415   :  { %v4318_v62 = vadd.f32 %v4317_v61, %v4233_v60 }
 0x417   :  { %v4323_v0 = vadd.f32 %v4321_v63, %v4318_v62 }
 0x419   :  { %v4862_v1 = vmul.f32 -1.442695, %v4323_v0 }
 0x41b   :  { %5737 = vpow2.f32 %v4862_v1 }
 0x428   :  { %v5738_v2 = vpop.eup %5737 }
 0x429   :  { %v4327_v3 = vadd.f32 1.0, %v5738_v2 }
 0x42b   :  { %5739 = vrcp.f32 %v4327_v3 }
 0x438   :  { %v5740_v4 = vpop.eup %5739 }
 0x439   :  { %4331 = vst.msk [vmem:[#allocation2] sm:$0x3] %vm4330_vm2, %v5740_v4 }
 0x43a   :  { %5752 = shalt.err (!%p5749_p4)
}
 0x43b   :  { %4341 = dma.vmem_to_hbm [thread:$0]  %s4339_s27, 32, %s7569_s4, [#allocation3]  }
 0x43c   :  { %5761 = dma.done.wait [#allocation3], 32  }
 0x43d   :  { %5762 = vsyncadd [#allocation3], 4294967264 }
 0x43e   :  { %4345 = vsyncpa [#allocation3], 1 }

</bundles_post_ra>
